<compile_context>
chip_gen: v7x
topology: tpu7x:2x2x1
jax: 0.10.0
libtpu: 0.0.40
codegen_flags: <defaults>
</compile_context>

<pallas_src>
import functools

import jax
import jax.numpy as jnp
from jax import lax
from jax.experimental import pallas as pl
from jax.experimental.pallas import tpu as pltpu


def _mha_kernel(q_ref, k_ref, v_ref,
                wq_ref, wk_ref, wv_ref, wo_ref,
                bq_ref, bk_ref, bv_ref, bo_ref,
                o_ref, *, H, P):
    # Contract the last dims of both operands (feeds the MXU directly, no .T).
    contract_last = (((1,), (1,)), ((), ()))

    q = q_ref[0]   # (TSN, N)
    k = k_ref[0]   # (SM, N)
    v = v_ref[0]   # (SM, N)

    # Fused full-width input projections; heads are head-major along lanes.
    # wq/bq are pre-scaled by P**-0.5 in the wrapper.
    qh = lax.dot_general(q, wq_ref[...], contract_last,
                         preferred_element_type=jnp.float32) + bq_ref[...]   # (TSN, H*P)
    kh = lax.dot_general(k, wk_ref[...], contract_last,
                         preferred_element_type=jnp.float32) + bk_ref[...]   # (SM, H*P)
    vh = lax.dot_general(v, wv_ref[...], contract_last,
                         preferred_element_type=jnp.float32) + bv_ref[...]   # (SM, H*P)

    # Per-head attention. H is small & static -> unrolled Python loop. Lane
    # slices at multiples of P avoid any relayout; the MXU handles P-wide
    # contractions fine.
    gammas = []
    for h in range(H):
        lo = h * P
        qh_h = qh[:, lo:lo + P]   # (TSN, P)
        kh_h = kh[:, lo:lo + P]   # (SM, P)
        vh_h = vh[:, lo:lo + P]   # (SM, P)

        s = lax.dot_general(qh_h, kh_h, contract_last,
                            preferred_element_type=jnp.float32)              # (TSN, SM)
        m = jnp.max(s, axis=-1, keepdims=True)
        e = jnp.exp(s - m)
        alpha = e * pl.reciprocal(jnp.sum(e, axis=-1, keepdims=True),
                                  approx=True)                               # EUP slot
        gammas.append(jnp.dot(alpha, vh_h,
                              preferred_element_type=jnp.float32))           # (TSN, P)

    # Single fused output projection over all heads.
    gamma = jnp.concatenate(gammas, axis=-1)                                  # (TSN, H*P)
    out = jnp.dot(gamma, wo_ref[...],
                  preferred_element_type=jnp.float32) + bo_ref[...]           # (TSN, N)
    o_ref[0] = out.astype(o_ref.dtype)


def _build_call(B, SN_pad, SM, N, H, P, TSN, *, single_buffer_weights):
    n_tiles = SN_pad // TSN
    kernel = functools.partial(_mha_kernel, H=H, P=P)

    def const_spec(shape):
        # Constant index map -> fetched once; a second pipeline buffer only
        # wastes VMEM (mandatory saving on v7x at realistic N).
        if single_buffer_weights:
            return pl.BlockSpec(shape, lambda b, i: (0, 0),
                                pipeline_mode=pl.Buffered(1))
        return pl.BlockSpec(shape, lambda b, i: (0, 0))

    # VMEM budget (f32): weights once + double-buffered activation/output
    # tiles, with 2x headroom; clamp to [32 MiB, 64 MiB] so the same setting
    # is valid on every generation (v5e/v6e could go higher, v7x cannot).
    f32 = 4
    est = (4 * H * P * N + 3 * H * P + N) * f32             # weight slabs + biases
    est += 2 * (TSN * N + 2 * SM * N + TSN * N) * f32       # q tile, k, v, out
    vmem_limit = int(min(max(2 * est, 32 * 1024 * 1024), 64 * 1024 * 1024))

    return pl.pallas_call(
        kernel,
        out_shape=jax.ShapeDtypeStruct((B, SN_pad, N), jnp.float32),
        grid=(B, n_tiles),
        in_specs=[
            pl.BlockSpec((1, TSN, N), lambda b, i: (b, i, 0)),   # Q tile
            pl.BlockSpec((1, SM, N), lambda b, i: (b, 0, 0)),    # K, resident over SN tiles
            pl.BlockSpec((1, SM, N), lambda b, i: (b, 0, 0)),    # V, resident over SN tiles
            const_spec((H * P, N)),   # WQ (pre-scaled by P**-0.5)
            const_spec((H * P, N)),   # WK
            const_spec((H * P, N)),   # WV
            const_spec((H * P, N)),   # WO
            const_spec((1, H * P)),   # BQ (pre-scaled)
            const_spec((1, H * P)),   # BK
            const_spec((1, H * P)),   # BV
            const_spec((1, N)),       # BO
        ],
        out_specs=pl.BlockSpec((1, TSN, N), lambda b, i: (b, i, 0)),
        compiler_params=pltpu.CompilerParams(
            dimension_semantics=("parallel", "parallel"),
            vmem_limit_bytes=vmem_limit),
    )


def dace_mha_forward(query, key, value, WQ, WK, WV, WO, BQ, BK, BV, BO,
                     *, P, H, sn_tile=256):
    """query/key/value: (S, B, N) float32, exactly like the PyTorch module."""
    N = H * P
    Q = jnp.transpose(query, (1, 0, 2))  # (B, SN, N)
    K = jnp.transpose(key, (1, 0, 2))    # (B, SM, N)
    V = jnp.transpose(value, (1, 0, 2))
    B, SN, _ = Q.shape
    _, SM, _ = K.shape
    scaler = float(P) ** -0.5

    # Glue: flatten (P, H, N) weights head-major to (H*P, N); row h*P+p == W[p, h, :].
    def wflat(W):
        return jnp.transpose(W, (1, 0, 2)).reshape(H * P, N)

    def bflat(Bv):
        return jnp.transpose(Bv, (1, 0)).reshape(1, H * P)

    # Fold the 1/sqrt(P) score scale into the Q projection (exact up to fp rounding).
    wq_r = wflat(WQ) * scaler
    bq_r = bflat(BQ) * scaler
    wk_r, wv_r, wo_r = wflat(WK), wflat(WV), wflat(WO)
    bk_r, bv_r = bflat(BK), bflat(BV)
    bo_r = BO.reshape(1, N)

    # Tile the query-sequence axis; pad to a multiple of the tile (padded rows
    # produce well-defined values and are sliced off afterwards).
    TSN = SN if SN <= sn_tile else sn_tile
    SN_pad = pl.cdiv(SN, TSN) * TSN
    if SN_pad != SN:
        Q = jnp.pad(Q, ((0, 0), (0, SN_pad - SN), (0, 0)))

    args = (Q, K, V, wq_r, wk_r, wv_r, wo_r, bq_r, bk_r, bv_r, bo_r)
    try:
        out = jax.block_until_ready(
            _build_call(B, SN_pad, SM, N, H, P, TSN,
                        single_buffer_weights=True)(*args))
    except Exception:
        # pl.Buffered(1) unsupported on this JAX/Mosaic build -> plain specs
        # (correctness identical; weights just get the default double buffer).
        out = _build_call(B, SN_pad, SM, N, H, P, TSN,
                          single_buffer_weights=False)(*args)

    out = out[:, :SN, :]
    return jnp.transpose(out, (1, 0, 2))  # back to (SN, B, N)


def mha_reference(query, key, value, WQ, WK, WV, WO, BQ, BK, BV, BO, *, P, H):
    """Pure-JAX reference of the same forward (substation einsums)."""
    Q = jnp.transpose(query, (1, 0, 2))
    K = jnp.transpose(key, (1, 0, 2))
    V = jnp.transpose(value, (1, 0, 2))
    scaler = float(P) ** -0.5
    qq = jnp.einsum('phi,bji->bphj', WQ, Q) + BQ[None, :, :, None]
    kk = jnp.einsum('phi,bki->bphk', WK, K) + BK[None, :, :, None]
    vv = jnp.einsum('phi,bki->bphk', WV, V) + BV[None, :, :, None]
    beta = scaler * jnp.einsum('bphj,bphk->bhjk', qq, kk)
    alpha = jax.nn.softmax(beta, axis=-1)
    gamma = jnp.einsum('bhjk,bphk->bphj', alpha, vv)
    out = jnp.einsum('phi,bphj->bji', WO, gamma) + BO[None, None, :]
    return jnp.transpose(out, (1, 0, 2))


def _xavier_uniform(prng, shape):
    # PyTorch xavier_uniform_ fan rules for a >2D tensor (P, H, N):
    # fan_in = H * N, fan_out = P * N.
    rec = 1
    for d in shape[2:]:
        rec *= d
    fan_in = shape[1] * rec
    fan_out = shape[0] * rec
    bound = (6.0 / (fan_in + fan_out)) ** 0.5
    return jax.random.uniform(prng, shape, jnp.float32, minval=-bound, maxval=bound)


if __name__ == "__main__":
    # Small deterministic problem: H=2 heads, P=16 head dim, N=H*P=32 embed,
    # SN=SM=8 sequence, B=2 batch.
    H, P = 2, 16
    N = H * P
    SN, SM, B = 8, 8, 2

    root = jax.random.PRNGKey(0)
    ks = jax.random.split(root, 11)

    WQ = _xavier_uniform(ks[0], (P, H, N))
    WK = _xavier_uniform(ks[1], (P, H, N))
    WV = _xavier_uniform(ks[2], (P, H, N))
    WO = _xavier_uniform(ks[3], (P, H, N))
    BQ = jax.random.uniform(ks[4], (P, H), jnp.float32)  # uniform_(): U(0, 1)
    BK = jax.random.uniform(ks[5], (P, H), jnp.float32)
    BV = jax.random.uniform(ks[6], (P, H), jnp.float32)
    BO = jax.random.uniform(ks[7], (N,), jnp.float32)

    q_in = jax.random.normal(ks[8], (SN, B, N), jnp.float32)
    k_in = jax.random.normal(ks[9], (SM, B, N), jnp.float32)
    v_in = jax.random.normal(ks[10], (SM, B, N), jnp.float32)

    out = dace_mha_forward(q_in, k_in, v_in, WQ, WK, WV, WO, BQ, BK, BV, BO, P=P, H=H)
    out = jax.block_until_ready(out)

    ref = mha_reference(q_in, k_in, v_in, WQ, WK, WV, WO, BQ, BK, BV, BO, P=P, H=H)
    assert out.shape == (SN, B, N)
    # Tolerance accounts for the approximate (EUP) reciprocal in the softmax
    # denominator; structure/bias/head-mixing bugs would far exceed this.
    assert jnp.allclose(out, ref, atol=5e-3, rtol=5e-3), \
        f"max abs err = {jnp.max(jnp.abs(out - ref))}"

    print("KERNEL_OK")
</pallas_src>

<mosaic_0001>
module attributes {stable_mosaic.version = 11 : i64} {
  func.func @_mha_kernel(%arg0: i32, %arg1: i32, %arg2: memref<1x8x32xf32, #tpu.memory_space<vmem>>, %arg3: memref<1x8x32xf32, #tpu.memory_space<vmem>>, %arg4: memref<1x8x32xf32, #tpu.memory_space<vmem>>, %arg5: memref<32x32xf32, #tpu.memory_space<vmem>>, %arg6: memref<32x32xf32, #tpu.memory_space<vmem>>, %arg7: memref<32x32xf32, #tpu.memory_space<vmem>>, %arg8: memref<32x32xf32, #tpu.memory_space<vmem>>, %arg9: memref<1x32xf32, #tpu.memory_space<vmem>>, %arg10: memref<1x32xf32, #tpu.memory_space<vmem>>, %arg11: memref<1x32xf32, #tpu.memory_space<vmem>>, %arg12: memref<1x32xf32, #tpu.memory_space<vmem>>, %arg13: memref<1x8x32xf32, #tpu.memory_space<vmem>>) attributes {dimension_semantics = [#tpu.dimension_semantics<parallel>, #tpu.dimension_semantics<parallel>], iteration_bounds = array<i64: 2, 1>, scalar_prefetch = 0 : i64, scratch_operands = 0 : i64, tpu.core_type = #tpu.core_type<tc>, window_params = [{transform_indices = @transform_0, window_bounds = array<i64: 1, 8, 32>}, {transform_indices = @transform_1, window_bounds = array<i64: 1, 8, 32>}, {transform_indices = @transform_2, window_bounds = array<i64: 1, 8, 32>}, {pipeline_mode = #tpu.pipeline_mode<synchronous>, transform_indices = @transform_3, window_bounds = array<i64: 32, 32>}, {pipeline_mode = #tpu.pipeline_mode<synchronous>, transform_indices = @transform_4, window_bounds = array<i64: 32, 32>}, {pipeline_mode = #tpu.pipeline_mode<synchronous>, transform_indices = @transform_5, window_bounds = array<i64: 32, 32>}, {pipeline_mode = #tpu.pipeline_mode<synchronous>, transform_indices = @transform_6, window_bounds = array<i64: 32, 32>}, {pipeline_mode = #tpu.pipeline_mode<synchronous>, transform_indices = @transform_7, window_bounds = array<i64: 1, 32>}, {pipeline_mode = #tpu.pipeline_mode<synchronous>, transform_indices = @transform_8, window_bounds = array<i64: 1, 32>}, {pipeline_mode = #tpu.pipeline_mode<synchronous>, transform_indices = @transform_9, window_bounds = array<i64: 1, 32>}, {pipeline_mode = #tpu.pipeline_mode<synchronous>, transform_indices = @transform_10, window_bounds = array<i64: 1, 32>}, {transform_indices = @transform_11, window_bounds = array<i64: 1, 8, 32>}]} {
    %c0 = arith.constant 0 : index
    %c0_0 = arith.constant 0 : index
    %c0_1 = arith.constant 0 : index
    %0 = vector.load %arg2[%c0, %c0_0, %c0_1] : memref<1x8x32xf32, #tpu.memory_space<vmem>>, vector<1x8x32xf32>
    %1 = vector.shape_cast %0 : vector<1x8x32xf32> to vector<8x32xf32>
    %c0_2 = arith.constant 0 : index
    %c0_3 = arith.constant 0 : index
    %c0_4 = arith.constant 0 : index
    %2 = vector.load %arg3[%c0_2, %c0_3, %c0_4] : memref<1x8x32xf32, #tpu.memory_space<vmem>>, vector<1x8x32xf32>
    %3 = vector.shape_cast %2 : vector<1x8x32xf32> to vector<8x32xf32>
    %c0_5 = arith.constant 0 : index
    %c0_6 = arith.constant 0 : index
    %c0_7 = arith.constant 0 : index
    %4 = vector.load %arg4[%c0_5, %c0_6, %c0_7] : memref<1x8x32xf32, #tpu.memory_space<vmem>>, vector<1x8x32xf32>
    %5 = vector.shape_cast %4 : vector<1x8x32xf32> to vector<8x32xf32>
    %c0_8 = arith.constant 0 : index
    %c0_9 = arith.constant 0 : index
    %6 = vector.load %arg5[%c0_8, %c0_9] : memref<32x32xf32, #tpu.memory_space<vmem>>, vector<32x32xf32>
    %cst = arith.constant dense<0.000000e+00> : vector<8x32xf32>
    %7 = tpu.matmul %1, %6, %cst {dimension_numbers = #tpu.dot_dimension_numbers<[1], [1], [0], [0], [0, 0, 1, 0], [], []>} : vector<8x32xf32>, vector<32x32xf32>, vector<8x32xf32> -> vector<8x32xf32>
    %c0_10 = arith.constant 0 : index
    %c0_11 = arith.constant 0 : index
    %8 = vector.load %arg9[%c0_10, %c0_11] : memref<1x32xf32, #tpu.memory_space<vmem>>, vector<1x32xf32>
    %9 = vector.broadcast %8 : vector<1x32xf32> to vector<8x32xf32>
    %10 = arith.addf %7, %9 : vector<8x32xf32>
    %c0_12 = arith.constant 0 : index
    %c0_13 = arith.constant 0 : index
    %11 = vector.load %arg6[%c0_12, %c0_13] : memref<32x32xf32, #tpu.memory_space<vmem>>, vector<32x32xf32>
    %cst_14 = arith.constant dense<0.000000e+00> : vector<8x32xf32>
    %12 = tpu.matmul %3, %11, %cst_14 {dimension_numbers = #tpu.dot_dimension_numbers<[1], [1], [0], [0], [0, 0, 1, 0], [], []>} : vector<8x32xf32>, vector<32x32xf32>, vector<8x32xf32> -> vector<8x32xf32>
    %c0_15 = arith.constant 0 : index
    %c0_16 = arith.constant 0 : index
    %13 = vector.load %arg10[%c0_15, %c0_16] : memref<1x32xf32, #tpu.memory_space<vmem>>, vector<1x32xf32>
    %14 = vector.broadcast %13 : vector<1x32xf32> to vector<8x32xf32>
    %15 = arith.addf %12, %14 : vector<8x32xf32>
    %c0_17 = arith.constant 0 : index
    %c0_18 = arith.constant 0 : index
    %16 = vector.load %arg7[%c0_17, %c0_18] : memref<32x32xf32, #tpu.memory_space<vmem>>, vector<32x32xf32>
    %cst_19 = arith.constant dense<0.000000e+00> : vector<8x32xf32>
    %17 = tpu.matmul %5, %16, %cst_19 {dimension_numbers = #tpu.dot_dimension_numbers<[1], [1], [0], [0], [0, 0, 1, 0], [], []>} : vector<8x32xf32>, vector<32x32xf32>, vector<8x32xf32> -> vector<8x32xf32>
    %c0_20 = arith.constant 0 : index
    %c0_21 = arith.constant 0 : index
    %18 = vector.load %arg11[%c0_20, %c0_21] : memref<1x32xf32, #tpu.memory_space<vmem>>, vector<1x32xf32>
    %19 = vector.broadcast %18 : vector<1x32xf32> to vector<8x32xf32>
    %20 = arith.addf %17, %19 : vector<8x32xf32>
    %21 = vector.extract_strided_slice %10 {offsets = [0, 0], sizes = [8, 16], strides = [1, 1]} : vector<8x32xf32> to vector<8x16xf32>
    %22 = vector.extract_strided_slice %15 {offsets = [0, 0], sizes = [8, 16], strides = [1, 1]} : vector<8x32xf32> to vector<8x16xf32>
    %23 = vector.extract_strided_slice %20 {offsets = [0, 0], sizes = [8, 16], strides = [1, 1]} : vector<8x32xf32> to vector<8x16xf32>
    %cst_22 = arith.constant dense<0.000000e+00> : vector<8x8xf32>
    %24 = tpu.matmul %21, %22, %cst_22 {dimension_numbers = #tpu.dot_dimension_numbers<[1], [1], [0], [0], [0, 0, 1, 0], [], []>} : vector<8x16xf32>, vector<8x16xf32>, vector<8x8xf32> -> vector<8x8xf32>
    %cst_23 = arith.constant dense<0xFF800000> : vector<8xf32>
    %25 = vector.multi_reduction <maximumf>, %24, %cst_23 [1] : vector<8x8xf32> to vector<8xf32>
    %26 = vector.shape_cast %25 : vector<8xf32> to vector<8x1xf32>
    %27 = vector.broadcast %26 : vector<8x1xf32> to vector<8x8xf32>
    %28 = arith.subf %24, %27 : vector<8x8xf32>
    %29 = math.exp %28 : vector<8x8xf32>
    %cst_24 = arith.constant dense<0.000000e+00> : vector<8xf32>
    %30 = vector.multi_reduction <add>, %29, %cst_24 [1] : vector<8x8xf32> to vector<8xf32>
    %31 = vector.shape_cast %30 : vector<8xf32> to vector<8x1xf32>
    %32 = tpu.reciprocal %31 {approx = true} : vector<8x1xf32> -> vector<8x1xf32>
    %33 = vector.broadcast %32 : vector<8x1xf32> to vector<8x8xf32>
    %34 = arith.mulf %29, %33 : vector<8x8xf32>
    %cst_25 = arith.constant dense<0.000000e+00> : vector<8x16xf32>
    %35 = tpu.matmul %34, %23, %cst_25 {dimension_numbers = #tpu.dot_dimension_numbers<[1], [0], [0], [1], [0, 0, 1, 1], [], []>} : vector<8x8xf32>, vector<8x16xf32>, vector<8x16xf32> -> vector<8x16xf32>
    %36 = vector.extract_strided_slice %10 {offsets = [0, 16], sizes = [8, 16], strides = [1, 1]} : vector<8x32xf32> to vector<8x16xf32>
    %37 = vector.extract_strided_slice %15 {offsets = [0, 16], sizes = [8, 16], strides = [1, 1]} : vector<8x32xf32> to vector<8x16xf32>
    %38 = vector.extract_strided_slice %20 {offsets = [0, 16], sizes = [8, 16], strides = [1, 1]} : vector<8x32xf32> to vector<8x16xf32>
    %cst_26 = arith.constant dense<0.000000e+00> : vector<8x8xf32>
    %39 = tpu.matmul %36, %37, %cst_26 {dimension_numbers = #tpu.dot_dimension_numbers<[1], [1], [0], [0], [0, 0, 1, 0], [], []>} : vector<8x16xf32>, vector<8x16xf32>, vector<8x8xf32> -> vector<8x8xf32>
    %cst_27 = arith.constant dense<0xFF800000> : vector<8xf32>
    %40 = vector.multi_reduction <maximumf>, %39, %cst_27 [1] : vector<8x8xf32> to vector<8xf32>
    %41 = vector.shape_cast %40 : vector<8xf32> to vector<8x1xf32>
    %42 = vector.broadcast %41 : vector<8x1xf32> to vector<8x8xf32>
    %43 = arith.subf %39, %42 : vector<8x8xf32>
    %44 = math.exp %43 : vector<8x8xf32>
    %cst_28 = arith.constant dense<0.000000e+00> : vector<8xf32>
    %45 = vector.multi_reduction <add>, %44, %cst_28 [1] : vector<8x8xf32> to vector<8xf32>
    %46 = vector.shape_cast %45 : vector<8xf32> to vector<8x1xf32>
    %47 = tpu.reciprocal %46 {approx = true} : vector<8x1xf32> -> vector<8x1xf32>
    %48 = vector.broadcast %47 : vector<8x1xf32> to vector<8x8xf32>
    %49 = arith.mulf %44, %48 : vector<8x8xf32>
    %cst_29 = arith.constant dense<0.000000e+00> : vector<8x16xf32>
    %50 = tpu.matmul %49, %38, %cst_29 {dimension_numbers = #tpu.dot_dimension_numbers<[1], [0], [0], [1], [0, 0, 1, 1], [], []>} : vector<8x8xf32>, vector<8x16xf32>, vector<8x16xf32> -> vector<8x16xf32>
    %51 = tpu.concatenate %35, %50 in 1 : vector<8x16xf32>, vector<8x16xf32> -> vector<8x32xf32>
    %c0_30 = arith.constant 0 : index
    %c0_31 = arith.constant 0 : index
    %52 = vector.load %arg8[%c0_30, %c0_31] : memref<32x32xf32, #tpu.memory_space<vmem>>, vector<32x32xf32>
    %cst_32 = arith.constant dense<0.000000e+00> : vector<8x32xf32>
    %53 = tpu.matmul %51, %52, %cst_32 {dimension_numbers = #tpu.dot_dimension_numbers<[1], [0], [0], [1], [0, 0, 1, 1], [], []>} : vector<8x32xf32>, vector<32x32xf32>, vector<8x32xf32> -> vector<8x32xf32>
    %c0_33 = arith.constant 0 : index
    %c0_34 = arith.constant 0 : index
    %54 = vector.load %arg12[%c0_33, %c0_34] : memref<1x32xf32, #tpu.memory_space<vmem>>, vector<1x32xf32>
    %55 = vector.broadcast %54 : vector<1x32xf32> to vector<8x32xf32>
    %56 = arith.addf %53, %55 : vector<8x32xf32>
    %c0_35 = arith.constant 0 : index
    %c0_36 = arith.constant 0 : index
    %c0_37 = arith.constant 0 : index
    %57 = vector.load %arg13[%c0_35, %c0_36, %c0_37] : memref<1x8x32xf32, #tpu.memory_space<vmem>>, vector<1x8x32xf32>
    %58 = vector.shape_cast %57 : vector<1x8x32xf32> to vector<8x32xf32>
    %59 = vector.shape_cast %56 : vector<8x32xf32> to vector<1x8x32xf32>
    tpu.vector_store %arg13[%c0_35, %c0_36, %c0_37], %59 {strides = array<i32>} : memref<1x8x32xf32, #tpu.memory_space<vmem>>, vector<1x8x32xf32>,
    return
  }
  func.func @transform_0(%arg0: i32, %arg1: i32) -> (i32, i32, i32) {
    %c0_i32 = arith.constant 0 : i32
    %c0_i32_0 = arith.constant 0 : i32
    return %arg0, %arg1, %c0_i32 : i32, i32, i32
  }
  func.func @transform_1(%arg0: i32, %arg1: i32) -> (i32, i32, i32) {
    %c0_i32 = arith.constant 0 : i32
    %c0_i32_0 = arith.constant 0 : i32
    %c0_i32_1 = arith.constant 0 : i32
    return %arg0, %c0_i32, %c0_i32_0 : i32, i32, i32
  }
  func.func @transform_2(%arg0: i32, %arg1: i32) -> (i32, i32, i32) {
    %c0_i32 = arith.constant 0 : i32
    %c0_i32_0 = arith.constant 0 : i32
    %c0_i32_1 = arith.constant 0 : i32
    return %arg0, %c0_i32, %c0_i32_0 : i32, i32, i32
  }
  func.func @transform_3(%arg0: i32, %arg1: i32) -> (i32, i32) {
    %c0_i32 = arith.constant 0 : i32
    %c0_i32_0 = arith.constant 0 : i32
    %c0_i32_1 = arith.constant 0 : i32
    return %c0_i32, %c0_i32_0 : i32, i32
  }
  func.func @transform_4(%arg0: i32, %arg1: i32) -> (i32, i32) {
    %c0_i32 = arith.constant 0 : i32
    %c0_i32_0 = arith.constant 0 : i32
    %c0_i32_1 = arith.constant 0 : i32
    return %c0_i32, %c0_i32_0 : i32, i32
  }
  func.func @transform_5(%arg0: i32, %arg1: i32) -> (i32, i32) {
    %c0_i32 = arith.constant 0 : i32
    %c0_i32_0 = arith.constant 0 : i32
    %c0_i32_1 = arith.constant 0 : i32
    return %c0_i32, %c0_i32_0 : i32, i32
  }
  func.func @transform_6(%arg0: i32, %arg1: i32) -> (i32, i32) {
    %c0_i32 = arith.constant 0 : i32
    %c0_i32_0 = arith.constant 0 : i32
    %c0_i32_1 = arith.constant 0 : i32
    return %c0_i32, %c0_i32_0 : i32, i32
  }
  func.func @transform_7(%arg0: i32, %arg1: i32) -> (i32, i32) {
    %c0_i32 = arith.constant 0 : i32
    %c0_i32_0 = arith.constant 0 : i32
    %c0_i32_1 = arith.constant 0 : i32
    return %c0_i32, %c0_i32_0 : i32, i32
  }
  func.func @transform_8(%arg0: i32, %arg1: i32) -> (i32, i32) {
    %c0_i32 = arith.constant 0 : i32
    %c0_i32_0 = arith.constant 0 : i32
    %c0_i32_1 = arith.constant 0 : i32
    return %c0_i32, %c0_i32_0 : i32, i32
  }
  func.func @transform_9(%arg0: i32, %arg1: i32) -> (i32, i32) {
    %c0_i32 = arith.constant 0 : i32
    %c0_i32_0 = arith.constant 0 : i32
    %c0_i32_1 = arith.constant 0 : i32
    return %c0_i32, %c0_i32_0 : i32, i32
  }
  func.func @transform_10(%arg0: i32, %arg1: i32) -> (i32, i32) {
    %c0_i32 = arith.constant 0 : i32
    %c0_i32_0 = arith.constant 0 : i32
    %c0_i32_1 = arith.constant 0 : i32
    return %c0_i32, %c0_i32_0 : i32, i32
  }
  func.func @transform_11(%arg0: i32, %arg1: i32) -> (i32, i32, i32) {
    %c0_i32 = arith.constant 0 : i32
    %c0_i32_0 = arith.constant 0 : i32
    return %arg0, %arg1, %c0_i32 : i32, i32, i32
  }
}

module attributes {stable_mosaic.version = 11 : i64} {
  func.func @_mha_kernel(%arg0: i32, %arg1: i32, %arg2: memref<1x8x32xf32, #tpu.memory_space<vmem>>, %arg3: memref<1x8x32xf32, #tpu.memory_space<vmem>>, %arg4: memref<1x8x32xf32, #tpu.memory_space<vmem>>, %arg5: memref<32x32xf32, #tpu.memory_space<vmem>>, %arg6: memref<32x32xf32, #tpu.memory_space<vmem>>, %arg7: memref<32x32xf32, #tpu.memory_space<vmem>>, %arg8: memref<32x32xf32, #tpu.memory_space<vmem>>, %arg9: memref<1x32xf32, #tpu.memory_space<vmem>>, %arg10: memref<1x32xf32, #tpu.memory_space<vmem>>, %arg11: memref<1x32xf32, #tpu.memory_space<vmem>>, %arg12: memref<1x32xf32, #tpu.memory_space<vmem>>, %arg13: memref<1x8x32xf32, #tpu.memory_space<vmem>>) attributes {dimension_semantics = [#tpu.dimension_semantics<parallel>, #tpu.dimension_semantics<parallel>], iteration_bounds = array<i64: 2, 1>, scalar_prefetch = 0 : i64, scratch_operands = 0 : i64, tpu.core_type = #tpu.core_type<tc>, window_params = [{transform_indices = @transform_0, window_bounds = array<i64: 1, 8, 32>}, {transform_indices = @transform_1, window_bounds = array<i64: 1, 8, 32>}, {transform_indices = @transform_2, window_bounds = array<i64: 1, 8, 32>}, {pipeline_mode = #tpu.pipeline_mode<synchronous>, transform_indices = @transform_3, window_bounds = array<i64: 32, 32>}, {pipeline_mode = #tpu.pipeline_mode<synchronous>, transform_indices = @transform_4, window_bounds = array<i64: 32, 32>}, {pipeline_mode = #tpu.pipeline_mode<synchronous>, transform_indices = @transform_5, window_bounds = array<i64: 32, 32>}, {pipeline_mode = #tpu.pipeline_mode<synchronous>, transform_indices = @transform_6, window_bounds = array<i64: 32, 32>}, {pipeline_mode = #tpu.pipeline_mode<synchronous>, transform_indices = @transform_7, window_bounds = array<i64: 1, 32>}, {pipeline_mode = #tpu.pipeline_mode<synchronous>, transform_indices = @transform_8, window_bounds = array<i64: 1, 32>}, {pipeline_mode = #tpu.pipeline_mode<synchronous>, transform_indices = @transform_9, window_bounds = array<i64: 1, 32>}, {pipeline_mode = #tpu.pipeline_mode<synchronous>, transform_indices = @transform_10, window_bounds = array<i64: 1, 32>}, {transform_indices = @transform_11, window_bounds = array<i64: 1, 8, 32>}]} {
    %c0 = arith.constant 0 : index
    %c0_0 = arith.constant 0 : index
    %c0_1 = arith.constant 0 : index
    %0 = vector.load %arg2[%c0, %c0_0, %c0_1] : memref<1x8x32xf32, #tpu.memory_space<vmem>>, vector<1x8x32xf32>
    %1 = vector.shape_cast %0 : vector<1x8x32xf32> to vector<8x32xf32>
    %c0_2 = arith.constant 0 : index
    %c0_3 = arith.constant 0 : index
    %c0_4 = arith.constant 0 : index
    %2 = vector.load %arg3[%c0_2, %c0_3, %c0_4] : memref<1x8x32xf32, #tpu.memory_space<vmem>>, vector<1x8x32xf32>
    %3 = vector.shape_cast %2 : vector<1x8x32xf32> to vector<8x32xf32>
    %c0_5 = arith.constant 0 : index
    %c0_6 = arith.constant 0 : index
    %c0_7 = arith.constant 0 : index
    %4 = vector.load %arg4[%c0_5, %c0_6, %c0_7] : memref<1x8x32xf32, #tpu.memory_space<vmem>>, vector<1x8x32xf32>
    %5 = vector.shape_cast %4 : vector<1x8x32xf32> to vector<8x32xf32>
    %c0_8 = arith.constant 0 : index
    %c0_9 = arith.constant 0 : index
    %6 = vector.load %arg5[%c0_8, %c0_9] : memref<32x32xf32, #tpu.memory_space<vmem>>, vector<32x32xf32>
    %cst = arith.constant dense<0.000000e+00> : vector<8x32xf32>
    %7 = tpu.matmul %1, %6, %cst {dimension_numbers = #tpu.dot_dimension_numbers<[1], [1], [0], [0], [0, 0, 1, 0], [], []>} : vector<8x32xf32>, vector<32x32xf32>, vector<8x32xf32> -> vector<8x32xf32>
    %c0_10 = arith.constant 0 : index
    %c0_11 = arith.constant 0 : index
    %8 = vector.load %arg9[%c0_10, %c0_11] : memref<1x32xf32, #tpu.memory_space<vmem>>, vector<1x32xf32>
    %9 = vector.broadcast %8 : vector<1x32xf32> to vector<8x32xf32>
    %10 = arith.addf %7, %9 : vector<8x32xf32>
    %c0_12 = arith.constant 0 : index
    %c0_13 = arith.constant 0 : index
    %11 = vector.load %arg6[%c0_12, %c0_13] : memref<32x32xf32, #tpu.memory_space<vmem>>, vector<32x32xf32>
    %cst_14 = arith.constant dense<0.000000e+00> : vector<8x32xf32>
    %12 = tpu.matmul %3, %11, %cst_14 {dimension_numbers = #tpu.dot_dimension_numbers<[1], [1], [0], [0], [0, 0, 1, 0], [], []>} : vector<8x32xf32>, vector<32x32xf32>, vector<8x32xf32> -> vector<8x32xf32>
    %c0_15 = arith.constant 0 : index
    %c0_16 = arith.constant 0 : index
    %13 = vector.load %arg10[%c0_15, %c0_16] : memref<1x32xf32, #tpu.memory_space<vmem>>, vector<1x32xf32>
    %14 = vector.broadcast %13 : vector<1x32xf32> to vector<8x32xf32>
    %15 = arith.addf %12, %14 : vector<8x32xf32>
    %c0_17 = arith.constant 0 : index
    %c0_18 = arith.constant 0 : index
    %16 = vector.load %arg7[%c0_17, %c0_18] : memref<32x32xf32, #tpu.memory_space<vmem>>, vector<32x32xf32>
    %cst_19 = arith.constant dense<0.000000e+00> : vector<8x32xf32>
    %17 = tpu.matmul %5, %16, %cst_19 {dimension_numbers = #tpu.dot_dimension_numbers<[1], [1], [0], [0], [0, 0, 1, 0], [], []>} : vector<8x32xf32>, vector<32x32xf32>, vector<8x32xf32> -> vector<8x32xf32>
    %c0_20 = arith.constant 0 : index
    %c0_21 = arith.constant 0 : index
    %18 = vector.load %arg11[%c0_20, %c0_21] : memref<1x32xf32, #tpu.memory_space<vmem>>, vector<1x32xf32>
    %19 = vector.broadcast %18 : vector<1x32xf32> to vector<8x32xf32>
    %20 = arith.addf %17, %19 : vector<8x32xf32>
    %21 = vector.extract_strided_slice %10 {offsets = [0, 0], sizes = [8, 16], strides = [1, 1]} : vector<8x32xf32> to vector<8x16xf32>
    %22 = vector.extract_strided_slice %15 {offsets = [0, 0], sizes = [8, 16], strides = [1, 1]} : vector<8x32xf32> to vector<8x16xf32>
    %23 = vector.extract_strided_slice %20 {offsets = [0, 0], sizes = [8, 16], strides = [1, 1]} : vector<8x32xf32> to vector<8x16xf32>
    %cst_22 = arith.constant dense<0.000000e+00> : vector<8x8xf32>
    %24 = tpu.matmul %21, %22, %cst_22 {dimension_numbers = #tpu.dot_dimension_numbers<[1], [1], [0], [0], [0, 0, 1, 0], [], []>} : vector<8x16xf32>, vector<8x16xf32>, vector<8x8xf32> -> vector<8x8xf32>
    %cst_23 = arith.constant dense<0xFF800000> : vector<8xf32>
    %25 = vector.multi_reduction <maximumf>, %24, %cst_23 [1] : vector<8x8xf32> to vector<8xf32>
    %26 = vector.shape_cast %25 : vector<8xf32> to vector<8x1xf32>
    %27 = vector.broadcast %26 : vector<8x1xf32> to vector<8x8xf32>
    %28 = arith.subf %24, %27 : vector<8x8xf32>
    %29 = math.exp %28 : vector<8x8xf32>
    %cst_24 = arith.constant dense<0.000000e+00> : vector<8xf32>
    %30 = vector.multi_reduction <add>, %29, %cst_24 [1] : vector<8x8xf32> to vector<8xf32>
    %31 = vector.shape_cast %30 : vector<8xf32> to vector<8x1xf32>
    %32 = tpu.reciprocal %31 {approx = true} : vector<8x1xf32> -> vector<8x1xf32>
    %33 = vector.broadcast %32 : vector<8x1xf32> to vector<8x8xf32>
    %34 = arith.mulf %29, %33 : vector<8x8xf32>
    %cst_25 = arith.constant dense<0.000000e+00> : vector<8x16xf32>
    %35 = tpu.matmul %34, %23, %cst_25 {dimension_numbers = #tpu.dot_dimension_numbers<[1], [0], [0], [1], [0, 0, 1, 1], [], []>} : vector<8x8xf32>, vector<8x16xf32>, vector<8x16xf32> -> vector<8x16xf32>
    %36 = vector.extract_strided_slice %10 {offsets = [0, 16], sizes = [8, 16], strides = [1, 1]} : vector<8x32xf32> to vector<8x16xf32>
    %37 = vector.extract_strided_slice %15 {offsets = [0, 16], sizes = [8, 16], strides = [1, 1]} : vector<8x32xf32> to vector<8x16xf32>
    %38 = vector.extract_strided_slice %20 {offsets = [0, 16], sizes = [8, 16], strides = [1, 1]} : vector<8x32xf32> to vector<8x16xf32>
    %cst_26 = arith.constant dense<0.000000e+00> : vector<8x8xf32>
    %39 = tpu.matmul %36, %37, %cst_26 {dimension_numbers = #tpu.dot_dimension_numbers<[1], [1], [0], [0], [0, 0, 1, 0], [], []>} : vector<8x16xf32>, vector<8x16xf32>, vector<8x8xf32> -> vector<8x8xf32>
    %cst_27 = arith.constant dense<0xFF800000> : vector<8xf32>
    %40 = vector.multi_reduction <maximumf>, %39, %cst_27 [1] : vector<8x8xf32> to vector<8xf32>
    %41 = vector.shape_cast %40 : vector<8xf32> to vector<8x1xf32>
    %42 = vector.broadcast %41 : vector<8x1xf32> to vector<8x8xf32>
    %43 = arith.subf %39, %42 : vector<8x8xf32>
    %44 = math.exp %43 : vector<8x8xf32>
    %cst_28 = arith.constant dense<0.000000e+00> : vector<8xf32>
    %45 = vector.multi_reduction <add>, %44, %cst_28 [1] : vector<8x8xf32> to vector<8xf32>
    %46 = vector.shape_cast %45 : vector<8xf32> to vector<8x1xf32>
    %47 = tpu.reciprocal %46 {approx = true} : vector<8x1xf32> -> vector<8x1xf32>
    %48 = vector.broadcast %47 : vector<8x1xf32> to vector<8x8xf32>
    %49 = arith.mulf %44, %48 : vector<8x8xf32>
    %cst_29 = arith.constant dense<0.000000e+00> : vector<8x16xf32>
    %50 = tpu.matmul %49, %38, %cst_29 {dimension_numbers = #tpu.dot_dimension_numbers<[1], [0], [0], [1], [0, 0, 1, 1], [], []>} : vector<8x8xf32>, vector<8x16xf32>, vector<8x16xf32> -> vector<8x16xf32>
    %51 = tpu.concatenate %35, %50 in 1 : vector<8x16xf32>, vector<8x16xf32> -> vector<8x32xf32>
    %c0_30 = arith.constant 0 : index
    %c0_31 = arith.constant 0 : index
    %52 = vector.load %arg8[%c0_30, %c0_31] : memref<32x32xf32, #tpu.memory_space<vmem>>, vector<32x32xf32>
    %cst_32 = arith.constant dense<0.000000e+00> : vector<8x32xf32>
    %53 = tpu.matmul %51, %52, %cst_32 {dimension_numbers = #tpu.dot_dimension_numbers<[1], [0], [0], [1], [0, 0, 1, 1], [], []>} : vector<8x32xf32>, vector<32x32xf32>, vector<8x32xf32> -> vector<8x32xf32>
    %c0_33 = arith.constant 0 : index
    %c0_34 = arith.constant 0 : index
    %54 = vector.load %arg12[%c0_33, %c0_34] : memref<1x32xf32, #tpu.memory_space<vmem>>, vector<1x32xf32>
    %55 = vector.broadcast %54 : vector<1x32xf32> to vector<8x32xf32>
    %56 = arith.addf %53, %55 : vector<8x32xf32>
    %c0_35 = arith.constant 0 : index
    %c0_36 = arith.constant 0 : index
    %c0_37 = arith.constant 0 : index
    %57 = vector.load %arg13[%c0_35, %c0_36, %c0_37] : memref<1x8x32xf32, #tpu.memory_space<vmem>>, vector<1x8x32xf32>
    %58 = vector.shape_cast %57 : vector<1x8x32xf32> to vector<8x32xf32>
    %59 = vector.shape_cast %56 : vector<8x32xf32> to vector<1x8x32xf32>
    tpu.vector_store %arg13[%c0_35, %c0_36, %c0_37], %59 {strides = array<i32>} : memref<1x8x32xf32, #tpu.memory_space<vmem>>, vector<1x8x32xf32>,
    return
  }
  func.func @transform_0(%arg0: i32, %arg1: i32) -> (i32, i32, i32) {
    %c0_i32 = arith.constant 0 : i32
    %c0_i32_0 = arith.constant 0 : i32
    return %arg0, %arg1, %c0_i32 : i32, i32, i32
  }
  func.func @transform_1(%arg0: i32, %arg1: i32) -> (i32, i32, i32) {
    %c0_i32 = arith.constant 0 : i32
    %c0_i32_0 = arith.constant 0 : i32
    %c0_i32_1 = arith.constant 0 : i32
    return %arg0, %c0_i32, %c0_i32_0 : i32, i32, i32
  }
  func.func @transform_2(%arg0: i32, %arg1: i32) -> (i32, i32, i32) {
    %c0_i32 = arith.constant 0 : i32
    %c0_i32_0 = arith.constant 0 : i32
    %c0_i32_1 = arith.constant 0 : i32
    return %arg0, %c0_i32, %c0_i32_0 : i32, i32, i32
  }
  func.func @transform_3(%arg0: i32, %arg1: i32) -> (i32, i32) {
    %c0_i32 = arith.constant 0 : i32
    %c0_i32_0 = arith.constant 0 : i32
    %c0_i32_1 = arith.constant 0 : i32
    return %c0_i32, %c0_i32_0 : i32, i32
  }
  func.func @transform_4(%arg0: i32, %arg1: i32) -> (i32, i32) {
    %c0_i32 = arith.constant 0 : i32
    %c0_i32_0 = arith.constant 0 : i32
    %c0_i32_1 = arith.constant 0 : i32
    return %c0_i32, %c0_i32_0 : i32, i32
  }
  func.func @transform_5(%arg0: i32, %arg1: i32) -> (i32, i32) {
    %c0_i32 = arith.constant 0 : i32
    %c0_i32_0 = arith.constant 0 : i32
    %c0_i32_1 = arith.constant 0 : i32
    return %c0_i32, %c0_i32_0 : i32, i32
  }
  func.func @transform_6(%arg0: i32, %arg1: i32) -> (i32, i32) {
    %c0_i32 = arith.constant 0 : i32
    %c0_i32_0 = arith.constant 0 : i32
    %c0_i32_1 = arith.constant 0 : i32
    return %c0_i32, %c0_i32_0 : i32, i32
  }
  func.func @transform_7(%arg0: i32, %arg1: i32) -> (i32, i32) {
    %c0_i32 = arith.constant 0 : i32
    %c0_i32_0 = arith.constant 0 : i32
    %c0_i32_1 = arith.constant 0 : i32
    return %c0_i32, %c0_i32_0 : i32, i32
  }
  func.func @transform_8(%arg0: i32, %arg1: i32) -> (i32, i32) {
    %c0_i32 = arith.constant 0 : i32
    %c0_i32_0 = arith.constant 0 : i32
    %c0_i32_1 = arith.constant 0 : i32
    return %c0_i32, %c0_i32_0 : i32, i32
  }
  func.func @transform_9(%arg0: i32, %arg1: i32) -> (i32, i32) {
    %c0_i32 = arith.constant 0 : i32
    %c0_i32_0 = arith.constant 0 : i32
    %c0_i32_1 = arith.constant 0 : i32
    return %c0_i32, %c0_i32_0 : i32, i32
  }
  func.func @transform_10(%arg0: i32, %arg1: i32) -> (i32, i32) {
    %c0_i32 = arith.constant 0 : i32
    %c0_i32_0 = arith.constant 0 : i32
    %c0_i32_1 = arith.constant 0 : i32
    return %c0_i32, %c0_i32_0 : i32, i32
  }
  func.func @transform_11(%arg0: i32, %arg1: i32) -> (i32, i32, i32) {
    %c0_i32 = arith.constant 0 : i32
    %c0_i32_0 = arith.constant 0 : i32
    return %arg0, %arg1, %c0_i32 : i32, i32, i32
  }
}

</mosaic_0001>

<bundles_post_ra>
// kernel: tpu_custom_call.1
= control target key start
LH: loop header
LB: loop body
LE: loop exit
PB: predicated region body
PF: predicated region fallthrough
CT: control target
= control target key end

     0   :  { %s2575_s0 = inlined_call_operand.hbm [shape: f32[2,8,32], index: 0, kind: input, shape index: {}]   ;;  %s2576_s1 = inlined_call_operand.hbm [shape: f32[2,8,32], index: 1, kind: input, shape index: {}]   ;;  %s2577_s2 = inlined_call_operand.hbm [shape: f32[2,8,32], index: 2, kind: input, shape index: {}]   ;;  %s2578_s3 = inlined_call_operand.hbm [shape: f32[32,32], index: 3, kind: input, shape index: {}]   ;;  %s2579_s4 = inlined_call_operand.hbm [shape: f32[32,32], index: 4, kind: input, shape index: {}]   ;;  %s2580_s5 = inlined_call_operand.hbm [shape: f32[32,32], index: 5, kind: input, shape index: {}]   ;;  %s2581_s6 = inlined_call_operand.hbm [shape: f32[32,32], index: 6, kind: input, shape index: {}]   ;;  %s2582_s7 = inlined_call_operand.vmem [shape: f32[1,32], index: 7, kind: input, shape index: {}]   ;;  %s2583_s8 = inlined_call_operand.vmem [shape: f32[1,32], index: 8, kind: input, shape index: {}]   ;;  %s2584_s9 = inlined_call_operand.vmem [shape: f32[1,32], index: 9, kind: input, shape index: {}]   ;;  %s2585_s10 = inlined_call_operand.vmem [shape: f32[1,32], index: 10, kind: input, shape index: {}]   ;;  %s2586_s11 = inlined_call_operand.hbm [shape: f32[2,8,32], index: 11, kind: output, shape index: {}]  }
   0x1   :  { %2613 = sst [smem:[#allocation28_spill]] %s2576_s1 }
   0x2   :  { %2614 = sst [smem:[#allocation29_spill]] %s2578_s3 }
   0x3   :  { %2615 = sst [smem:[#allocation30_spill]] %s2580_s5 }
   0x4   :  { %2616 = sst [smem:[#allocation31_spill]] %s2584_s9 }
   0x5   :  { %2617 = sst [smem:[#allocation32_spill]] %s2585_s10 }
   0x6   :  { %2618 = sst [smem:[#allocation33_spill]] %s2586_s11 }
   0x7   :  { %16 = vsyncpa [#allocation3], 0 }
   0x8   :  { %18 = vsyncpa [#allocation3 + $0x1], 0 }
   0x9   :  { %19 = vsyncpa [#allocation6], 0 }
   0xa   :  { %21 = vsyncpa [#allocation6 + $0x1], 0 }
   0xb   :  { %22 = vsyncpa [#allocation9], 0 }
   0xc   :  { %23 = vsyncpa [#allocation12], 0 }
   0xd   :  { %24 = vsyncpa [#allocation4], 0 }
   0xe   :  { %26 = vsyncpa [#allocation4 + $0x1], 0  ;;  %s2110_s17 = smov 0   ;;  %s2112_s18 = smov 0  }
   0xf   :  { %s2114_s19 = smov 0   ;;  %s2116_s20 = smov 0  }
  0x10   :  { %s2118_s21 = smov 0   ;;  %s2120_s22 = smov 0  }
  0x11 LB: > { %2619 = sst [smem:[#allocation20_spill]] %s2013_s17  ;;  %s2141_s23 = sadd.s32 4294967295, %s2033_s22   ;;  %s2033_s22 = sphi %s2120_s22, %s32_s22   ;;  %s2029_s21 = sphi %s2118_s21, %s2668_s21   ;;  %s2025_s20 = sphi %s2116_s20, %s2667_s20   ;;  %s2021_s19 = sphi %s2114_s19, %s2671_s19   ;;  %s2017_s18 = sphi %s2112_s18, %s2670_s18   ;;  %s2013_s17 = sphi %s2110_s17, %s2669_s17  }
  0x12   : > { %2620 = sst [smem:[#allocation21_spill]] %s2025_s20  ;;  %p1436_p0 = scmp.ge.s32.totalorder %s2033_s22, 1 }
  0x13   : > { %2621 = sst [smem:[#allocation22_spill]] %s2029_s21  ;;  %p2597_p1 = scmp.eq.s32.totalorder %s2141_s23, 0 }
  0x14   : > { %2622 = sst [smem:[#allocation23_spill]] %s2033_s22  ;;  %p325_p2 = scmp.lt.s32.totalorder %s2033_s22, 3 }
  0x15   : > { %s2035_s25 = smov [#allocation8]   ;;  %s2036_s28 = smov [#allocation11]  }
  0x16   : > { %p2146_p3 = pnand %p1436_p0, %p325_p2  ;;  %s337_s26 = sshll.u32 %s2035_s25, 4  ;;  %s2150_s26 = int_to_ptr.vmem [resolvable:$true] %s337_s26 }
  0x17   : > { %s363_s29 = sshll.u32 %s2036_s28, 4  ;;  %s2625_s3 = sld [smem:[#allocation29_spill]]  ;;  %s2161_s29 = int_to_ptr.vmem [resolvable:$true] %s363_s29 }
  0x18   : > { %s2623_s24 = scalar_select %p2146_p3, 1, 0 }
  0x19   : > { %p1633_p4 = pneg %p2146_p3 }
  0x1b   : > { %p2157_p6 = pnand %p1633_p4, %p2597_p1 }
  0x1d   : > { %s2624_s27 = scalar_select %p2157_p6, 1, 0 }
  0x1e   : > { %s1737_s13 = scalar_lea.hbm %s2625_s3, 512  ;;  %p2171_p8 = pneg %p2157_p6 }
  0x1f   : > { %p1738_p7 = scmp.ne.s32.totalorder %s2625_s3, %s1737_s13  ;;  %p1744_p11 = scmp.lt.u32.totalorder %s1737_s13, %s2625_s3 }
  0x20   : > { %s2626_s16 = scalar_select %p2171_p8, 1, 0 }
  0x21   : > { %p1740_p9 = pnand %p2171_p8, %p1738_p7 }
  0x23   : > { %p1741_p10 = pneg %p1740_p9 }
  0x25   : > { %p1746_p12 = pnand %p1744_p11, %p1741_p10 }
  0x27   : > { %1749 = shalt.err (!%p1746_p12)
}
  0x28   : > { %s1750_s30 = scalar_lea.vmem %s2150_s26, 512  ;;  %p1758_p4 = scmp.lt.s32.totalorder %s2150_s26, %s2150_s26 }
  0x29   : > { %p1751_p13 = scmp.ne.s32.totalorder %s2150_s26, %s1750_s30  ;;  %p1759_p5 = scmp.lt.s32.totalorder %s1750_s30, %s1750_s30 }
  0x2b   : > { %p1753_p0 = pnand %p1751_p13, %p2171_p8  ;;  %p1760_p7 = por %p1759_p5, %p1758_p4 }
  0x2d   : > { %p1754_p2 = pneg %p1753_p0 }
  0x2f   : > { %p1761_p9 = pnand %p1760_p7, %p1754_p2 }
  0x31   : > { %1764 = shalt.err (!%p1761_p9)
}
  0x32   : > { %s2588_s12 = smov 128   ;;  %s2590_s13 = smov 8  }
  0x33   : > { %1636 = dma.hbm_to_vmem [thread:$0]  (!%p2157_p6), %s2625_s3, 512, %s2150_s26, [#allocation9], %s2588_s12, %s2588_s12, %s2590_s13  }
  0x34   : > { %s2627_s5 = sld [smem:[#allocation30_spill]] }
  0x3a   : > { %s1765_s30 = scalar_lea.hbm %s2627_s5, 512 }
  0x3b   : > { %p1766_p5 = scmp.ne.s32.totalorder %s2627_s5, %s1765_s30  ;;  %p1772_p12 = scmp.lt.u32.totalorder %s1765_s30, %s2627_s5 }
  0x3d   : > { %p1768_p10 = pnand %p1766_p5, %p2171_p8 }
  0x3f   : > { %p1769_p11 = pneg %p1768_p10 }
  0x41   : > { %p1774_p13 = pnand %p1772_p12, %p1769_p11 }
  0x43   : > { %1777 = shalt.err (!%p1774_p13)
}
  0x44   : > { %s1778_s26 = scalar_lea.vmem %s2161_s29, 512  ;;  %p1786_p7 = scmp.lt.s32.totalorder %s2161_s29, %s2161_s29 }
  0x45   : > { %p1779_p0 = scmp.ne.s32.totalorder %s2161_s29, %s1778_s26  ;;  %p1787_p9 = scmp.lt.s32.totalorder %s1778_s26, %s1778_s26 }
  0x47   : > { %p1781_p2 = pnand %p1779_p0, %p2171_p8  ;;  %p1788_p5 = por %p1787_p9, %p1786_p7 }
  0x49   : > { %p1782_p4 = pneg %p1781_p2 }
  0x4b   : > { %p1789_p10 = pnand %p1788_p5, %p1782_p4 }
  0x4d   : > { %1792 = shalt.err (!%p1789_p10)
}
  0x4e   : > { %1642 = dma.hbm_to_vmem [thread:$0]  (!%p2157_p6), %s2627_s5, 512, %s2161_s29, [#allocation12], %s2588_s12, %s2588_s12, %s2590_s13  }
  0x4f   : > { %s1435_s11 = sadd.s32 4294967294, %s2033_s22   ;;  %s44_s20 = sadd.s32 1, %s2029_s21 }
  0x50   : > { %p46_p11 = scmp.ge.s32.totalorder %s44_s20, 2  ;;  %s53_s14 = sadd.s32 1, %s2021_s19 }
  0x51   : > { %p60_p12 = scmp.ne.s32.totalorder %s2021_s19, %s2017_s18  ;;  %p61_p13 = scmp.eq.s32.totalorder %s2033_s22, 0 }
  0x52   : > { %s2673_s20 = smov (%p46_p11, %s44_s20), 0  ;;  %p66_p2 = scmp.ne.s32.totalorder %s2017_s18, %s2013_s17 }
  0x53   : > { %2628 = sst [smem:[#allocation24_spill]] %s2673_s20  ;;  %p2229_p0 = por %p61_p13, %p60_p12 }
  0x54   : > { %s48_s29 = ssub.s32 %s2029_s21, %s2673_s20  ;;  %p312_p4 = scmp.eq.s32.totalorder %s2141_s23, 1 }
  0x55   : > { %p51_p7 = scmp.eq.s32.totalorder %s48_s29, 0  ;;  %p2240_p9 = por %p2597_p1, %p66_p2 }
  0x56   : > { %p2244_p5 = por %p312_p4, %p60_p12  ;;  %p318_p10 = scmp.eq.s32.totalorder %s1435_s11, 1 }
  0x57   : > { %s2630_s25 = scalar_select %p2240_p9, 1, 0 }
  0x58   : > { %s2631_s28 = scalar_select %p2244_p5, 1, 0 }
  0x59   : > { %s2249_s30 = scalar_select %p51_p7, %s2021_s19, %s53_s14  }
  0x5a   : > { %2632 = sst [smem:[#allocation25_spill]] %s2631_s28  ;;  %p2251_p11 = por %p318_p10, %p66_p2 }
  0x5b   : > { %2633 = sst [smem:[#allocation26_spill]] %s2249_s30  ;;  %p1664_p13 = scmp.lt.s32.totalorder %s2033_s22, 2 }
  0x5c   : > { %s2634_s26 = scalar_select %p2251_p11, 1, 0 }
  0x5d   : > { %s2592_s9 = sand.u32 1, %s2021_s19   ;;  %s2258_s10 = sshll.u32 %s2029_s21, 7 }
  0x5e   : > { %2635 = sst [smem:[#allocation27_spill]] %s2634_s26  ;;  %s2262_s29 = sshll.u32 %s2592_s9, 3 }
  0x5f   : > { %p2266_p12 = pnand %p1664_p13, %p2229_p0  ;;  %s421_s11 = sand.u32 1, %s2033_s22  }
  0x60   : > { %s2637_s1 = sld [smem:[#allocation28_spill]]  ;;  %s425_s5 = scalar_lea.vmem [#allocation5], %s2262_s29 }
  0x61   : > { %s2636_s12 = scalar_select %p2266_p12, 1, 0 }
  0x62   : > { %s432_s9 = sshll.u32 %s425_s5, 4  ;;  %s2280_s15 = scalar_lea.sflag [#allocation6], %s421_s11  ;;  %s2278_s9 = int_to_ptr.vmem [resolvable:$true] %s432_s9 }
  0x63   : > { %p2286_p2 = pneg %p2266_p12 }
  0x65   : > { %s2638_s21 = scalar_select %p2286_p2, 1, 0 }
  0x66   : > { %s2275_s3 = scalar_lea.hbm %s2637_s1, %s2258_s10  ;;  %s1798_s30 = scalar_lea.hbm %s2637_s1, 256 }
  0x67   : > { %s1793_s20 = scalar_lea.hbm %s2275_s3, 128  ;;  %p1799_p10 = scmp.lt.u32.totalorder %s2275_s3, %s2637_s1 }
  0x68   : > { %p1794_p0 = scmp.ne.s32.totalorder %s2275_s3, %s1793_s20  ;;  %p1800_p13 = scmp.lt.u32.totalorder %s1798_s30, %s1793_s20 }
  0x69   : > { %p1802_p11 = scmp.lt.u32.totalorder %s1793_s20, %s2275_s3 }
  0x6a   : > { %p1796_p4 = pnand %p2286_p2, %p1794_p0  ;;  %p1801_p1 = por %p1800_p13, %p1799_p10 }
  0x6c   : > { %p1797_p7 = pneg %p1796_p4  ;;  %p1803_p5 = por %p1802_p11, %p1801_p1 }
  0x6e   : > { %p1804_p9 = pnand %p1803_p5, %p1797_p7 }
  0x70   : > { %1807 = shalt.err (!%p1804_p9)
}
  0x71   : > { %s1808_s11 = scalar_lea.vmem %s2278_s9, 128  ;;  %s2039_s13 = smov [#allocation5]  }
  0x72   : > { %p1809_p0 = scmp.ne.s32.totalorder %s2278_s9, %s1808_s11  ;;  %s1813_s14 = sshll.u32 %s2039_s13, 4  ;;  %s1814_s14 = int_to_ptr.vmem [resolvable:$false] %s1813_s14 }
  0x73   : > { %s1815_s22 = scalar_lea.vmem %s1814_s14, 256  ;;  %p1816_p6 = scmp.lt.s32.totalorder %s2278_s9, %s1814_s14 }
  0x74   : > { %p1811_p4 = pnand %p1809_p0, %p2286_p2  ;;  %p1817_p8 = scmp.lt.s32.totalorder %s1815_s22, %s1808_s11 }
  0x76   : > { %p1812_p3 = pneg %p1811_p4  ;;  %p1818_p10 = por %p1817_p8, %p1816_p6 }
  0x78   : > { %p1819_p13 = pnand %p1818_p10, %p1812_p3 }
  0x7a   : > { %1822 = shalt.err (!%p1819_p13)
}
  0x7b   : > { %1652 = dma.hbm_to_vmem [thread:$0]  (!%p2266_p12), %s2275_s3, 128, %s2278_s9, %s2280_s15  }
  0x7c   : > { %s2040_s20 = smov [#allocation10]   ;;  %s2041_s5 = smov [#allocation13]  }
  0x7d   : > { %s350_s30 = sshll.u32 %s2040_s20, 4  ;;  %s376_s1 = sshll.u32 %s2041_s5, 4  ;;  %s351_s30 = int_to_ptr.vmem [resolvable:$true] %s350_s30  ;;  %s377_s1 = int_to_ptr.vmem [resolvable:$true] %s376_s1 }
  0x7e   : > { %s1823_s14 = scalar_lea.hbm %s2579_s4, 512  ;;  %p2639_p3 = scmp.ne.s32.totalorder %s2626_s16, 0 }
  0x7f   : > { %p1824_p1 = scmp.ne.s32.totalorder %s2579_s4, %s1823_s14  ;;  %p1830_p9 = scmp.lt.u32.totalorder %s1823_s14, %s2579_s4 }
  0x81   : > { %p1826_p6 = pnand %p1824_p1, %p2639_p3 }
  0x83   : > { %p1827_p8 = pneg %p1826_p6 }
  0x85   : > { %p1832_p5 = pnand %p1830_p9, %p1827_p8 }
  0x87   : > { %1835 = shalt.err (!%p1832_p5)
}
  0x88   : > { %s1836_s3 = scalar_lea.vmem %s351_s30, 512  ;;  %p1844_p4 = scmp.lt.s32.totalorder %s351_s30, %s351_s30 }
  0x89   : > { %p1837_p11 = scmp.ne.s32.totalorder %s351_s30, %s1836_s3  ;;  %p1845_p10 = scmp.lt.s32.totalorder %s1836_s3, %s1836_s3 }
  0x8b   : > { %p1839_p7 = pnand %p1837_p11, %p2639_p3  ;;  %p1846_p13 = por %p1845_p10, %p1844_p4 }
  0x8d   : > { %p1840_p0 = pneg %p1839_p7 }
  0x8f   : > { %p1847_p12 = pnand %p1846_p13, %p1840_p0 }
  0x91   : > { %1850 = shalt.err (!%p1847_p12)
}
  0x92   : > { %p2640_p1 = scmp.ne.s32.totalorder %s2624_s27, 0  ;;  %s2641_s26 = smov 8  }
  0x93   : > { %s2642_s9 = smov 128   ;;  %s1851_s13 = scalar_lea.hbm %s2581_s6, 512 }
  0x94   : > { %1639 = dma.hbm_to_vmem [thread:$0]  (!%p2640_p1), %s2579_s4, 512, %s351_s30, [#allocation9], %s2642_s9, %s2642_s9, %s2641_s26  }
  0x95   : > { %p1852_p6 = scmp.ne.s32.totalorder %s2581_s6, %s1851_s13  ;;  %p1858_p9 = scmp.lt.u32.totalorder %s1851_s13, %s2581_s6 }
  0x97   : > { %p1854_p12 = pnand %p1852_p6, %p2639_p3 }
  0x99   : > { %p1855_p8 = pneg %p1854_p12 }
  0x9b   : > { %p1860_p5 = pnand %p1858_p9, %p1855_p8 }
  0x9d   : > { %1863 = shalt.err (!%p1860_p5)
}
  0x9e   : > { %s1864_s17 = scalar_lea.vmem %s377_s1, 512  ;;  %p1872_p4 = scmp.lt.s32.totalorder %s377_s1, %s377_s1 }
  0x9f   : > { %p1865_p11 = scmp.ne.s32.totalorder %s377_s1, %s1864_s17  ;;  %p1873_p10 = scmp.lt.s32.totalorder %s1864_s17, %s1864_s17 }
  0xa1   : > { %p1867_p7 = pnand %p1865_p11, %p2639_p3  ;;  %p1874_p13 = por %p1873_p10, %p1872_p4 }
  0xa3   : > { %p1868_p0 = pneg %p1867_p7 }
  0xa5   : > { %p1875_p2 = pnand %p1874_p13, %p1868_p0 }
  0xa7   : > { %1878 = shalt.err (!%p1875_p2)
}
  0xa8   : > { %1645 = dma.hbm_to_vmem [thread:$0]  (!%p2640_p1), %s2581_s6, 512, %s377_s1, [#allocation12], %s2642_s9, %s2642_s9, %s2641_s26  }
  0xa9   : > { %s2356_s5 = scalar_lea.hbm %s2575_s0, %s2258_s10  ;;  %s406_s27 = scalar_lea.vmem [#allocation2], %s2262_s29 }
  0xaa   : > { %s414_s13 = sshll.u32 %s406_s27, 4  ;;  %s2365_s22 = scalar_lea.hbm %s2577_s2, %s2258_s10  ;;  %s2359_s13 = int_to_ptr.vmem [resolvable:$true] %s414_s13 }
  0xab   : > { %s2643_s3 = sand.u32 1, %s2021_s19   ;;  %s1879_s26 = scalar_lea.hbm %s2356_s5, 128 }
  0xac   : > { %s403_s1 = scalar_lea.sflag [#allocation3], %s2643_s3  ;;  %p1880_p2 = scmp.ne.s32.totalorder %s2356_s5, %s1879_s26 }
  0xad   : > { %p2644_p3 = scmp.ne.s32.totalorder %s2638_s21, 0  ;;  %s1884_s30 = scalar_lea.hbm %s2575_s0, 256 }
  0xae   : > { %p1885_p12 = scmp.lt.u32.totalorder %s2356_s5, %s2575_s0  ;;  %p1886_p8 = scmp.lt.u32.totalorder %s1884_s30, %s1879_s26 }
  0xaf   : > { %p1882_p1 = pnand %p1880_p2, %p2644_p3  ;;  %p1888_p5 = scmp.lt.u32.totalorder %s1879_s26, %s2356_s5 }
  0xb0   : > { %p1887_p9 = por %p1886_p8, %p1885_p12 }
  0xb1   : > { %p1883_p6 = pneg %p1882_p1 }
  0xb2   : > { %p1889_p11 = por %p1888_p5, %p1887_p9 }
  0xb4   : > { %p1890_p7 = pnand %p1889_p11, %p1883_p6 }
  0xb6   : > { %1893 = shalt.err (!%p1890_p7)
}
  0xb7   : > { %s1894_s10 = scalar_lea.vmem %s2359_s13, 128  ;;  %s2042_s20 = smov [#allocation2]  }
  0xb8   : > { %p1895_p0 = scmp.ne.s32.totalorder %s2359_s13, %s1894_s10  ;;  %s1899_s27 = sshll.u32 %s2042_s20, 4  ;;  %s1900_s27 = int_to_ptr.vmem [resolvable:$false] %s1899_s27 }
  0xb9   : > { %s1901_s14 = scalar_lea.vmem %s1900_s27, 256  ;;  %p1902_p13 = scmp.lt.s32.totalorder %s2359_s13, %s1900_s27 }
  0xba   : > { %p1897_p4 = pnand %p1895_p0, %p2644_p3  ;;  %p1903_p2 = scmp.lt.s32.totalorder %s1901_s14, %s1894_s10 }
  0xbc   : > { %p1898_p10 = pneg %p1897_p4  ;;  %p1904_p1 = por %p1903_p2, %p1902_p13 }
  0xbe   : > { %p1905_p12 = pnand %p1904_p1, %p1898_p10 }
  0xc0   : > { %1908 = shalt.err (!%p1905_p12)
}
  0xc1   : > { %p2645_p6 = scmp.ne.s32.totalorder %s2636_s12, 0  ;;  %s443_s11 = scalar_lea.vmem [#allocation7], %s2262_s29 }
  0xc2   : > { %s450_s3 = sshll.u32 %s443_s11, 4  ;;  %s1909_s26 = scalar_lea.hbm %s2365_s22, 128  ;;  %s451_s3 = int_to_ptr.vmem [resolvable:$true] %s450_s3 }
  0xc3   : > { %1649 = dma.hbm_to_vmem [thread:$0]  (!%p2645_p6), %s2356_s5, 128, %s2359_s13, %s403_s1  }
  0xc4   : > { %p1910_p8 = scmp.ne.s32.totalorder %s2365_s22, %s1909_s26  ;;  %s1914_s30 = scalar_lea.hbm %s2577_s2, 256 }
  0xc5   : > { %p1915_p11 = scmp.lt.u32.totalorder %s2365_s22, %s2577_s2  ;;  %p1916_p7 = scmp.lt.u32.totalorder %s1914_s30, %s1909_s26 }
  0xc6   : > { %p1912_p9 = pnand %p1910_p8, %p2644_p3  ;;  %p1918_p4 = scmp.lt.u32.totalorder %s1909_s26, %s2365_s22 }
  0xc7   : > { %p1917_p0 = por %p1916_p7, %p1915_p11 }
  0xc8   : > { %p1913_p5 = pneg %p1912_p9 }
  0xc9   : > { %p1919_p10 = por %p1918_p4, %p1917_p0 }
  0xcb   : > { %p1920_p13 = pnand %p1919_p10, %p1913_p5 }
  0xcd   : > { %1923 = shalt.err (!%p1920_p13)
}
  0xce   : > { %s1924_s29 = scalar_lea.vmem %s451_s3, 128  ;;  %s2043_s5 = smov [#allocation7]  }
  0xcf   : > { %p1925_p2 = scmp.ne.s32.totalorder %s451_s3, %s1924_s29  ;;  %s1929_s13 = sshll.u32 %s2043_s5, 4  ;;  %s1930_s13 = int_to_ptr.vmem [resolvable:$false] %s1929_s13 }
  0xd0   : > { %s1931_s1 = scalar_lea.vmem %s1930_s13, 256  ;;  %p1932_p8 = scmp.lt.s32.totalorder %s451_s3, %s1930_s13 }
  0xd1   : > { %p1927_p1 = pnand %p1925_p2, %p2644_p3  ;;  %p1933_p9 = scmp.lt.s32.totalorder %s1931_s1, %s1924_s29 }
  0xd3   : > { %p1928_p12 = pneg %p1927_p1  ;;  %p1934_p6 = por %p1933_p9, %p1932_p8 }
  0xd5   : > { %p1935_p7 = pnand %p1934_p6, %p1928_p12 }
  0xd7   : > { %1938 = shalt.err (!%p1935_p7)
}
  0xd8   : > { %p2646_p11 = scmp.ne.s32.totalorder %s2636_s12, 0  ;;  %p2647_p5 = scmp.ne.s32.totalorder %s2623_s24, 0 }
  0xd9   : > { %s2412_s21 = sand.u32 (!%p2647_p5), 1, %s2017_s18   ;;  %p2648_p3 = scmp.ne.s32.totalorder (!%p2647_p5), %s2630_s25, 0 }
  0xda   : > { %1655 = dma.hbm_to_vmem [thread:$0]  (!%p2646_p11), %s2365_s22, 128, %s451_s3, %s2280_s15  }
  0xdb   : > { %459 = sbr.rel (%p2647_p5) target bundleno = 2085 (0x825), region = 64  ;;  %s2415_s10 = sshll.u32 (!%p2647_p5), %s2412_s21, 3 }
  0xdc   : > { %s462_s20 = scalar_lea.sflag (!%p2647_p5), [#allocation3], %s2412_s21  ;;  %s465_s27 = scalar_lea.vmem (!%p2647_p5), [#allocation2], %s2415_s10 }
  0xe2   : > { %1992 = dma.done.wait (%p2648_p3), %s462_s20, 128  }
  0xe3   : > { %1994 = vsyncadd (%p2648_p3), %s462_s20, 4294967168  ;;  %s470_s24 = sand.u32 1, %s2141_s23   ;;  %s474_s15 = scalar_lea.vmem [#allocation5], %s2415_s10 }
  0xe4   : > { %s471_s12 = scalar_lea.sflag [#allocation6], %s470_s24 }
  0xe5   : > { %1996 = dma.done.wait (%p2648_p3), %s471_s12, 256  }
  0xe6   : > { %1998 = vsyncadd (%p2648_p3), %s471_s12, 4294967040  ;;  %s483_s22 = scalar_lea.vmem [#allocation7], %s2415_s10  ;;  %p2649_p6 = scmp.eq.s32.totalorder %s2141_s23, 0 }
  0xe8   : > { %2000 = dma.done.wait (%p2649_p6), [#allocation9], 1024   ;;  %p2650_p0 = pmov %p2649_p6 }
  0xea   : > { %2002 = vsyncadd (%p2650_p0), [#allocation9], 4294966272  ;;  %p2651_p4 = pmov %p2650_p0 }
  0xeb   : > { %p2652_p10 = pmov %p2650_p0 }
  0xec   : > { %2004 = dma.done.wait (%p2651_p4), [#allocation12], 1024  }
  0xed   : > { %2006 = vsyncadd (%p2652_p10), [#allocation12], 4294966272  ;;  %v2044_v0 = vmov 0.0|0.0   ;;  %vm2045_vm0 = vmmov 0   ;;  %v2046_v1 = vmov 0.0   ;;  %vm562_vm1 = vcmask 261120  }
  0xee   : > { %1587 = vmatprep.subr.bf16.mxu1 %v2044_v0  ;;  %1579 = vmatprep.subr.bf16.mxu0 %v2044_v0  ;;  %vm2446_vm2 = vmpackc.low %vm562_vm1, %vm562_vm1  ;;  %v648_v3 = vld [vmem:[#allocation10] sm:$0xff]  ;;  %v649_v4 = vld [vmem:[#allocation10 + $0x8] sm:$0xff]  ;;  %vm840_vm3 = vcmask 130048   ;;  %s2047_s3 = smov 112   ;;  %vm917_vm4 = vcmask 64512   ;;  %s2655_s17 = sld [smem:[#allocation31_spill]] }
  0xef   : > { %1534 = vmatprep.mubr.msk.f32.mxu1 %vm2045_vm0, %v2046_v1  ;;  %1523 = vmatprep.mubr.msk.f32.mxu0 %vm2045_vm0, %v2046_v1  ;;  %v551_v5 = vld [vmem:[#allocation8] sm:$0xff]  ;;  %v1588_v6 = vpack.c.bf16 %v649_v4, %v648_v3  ;;  %v552_v7 = vld [vmem:[#allocation8 + $0x8] sm:$0xff]  ;;  %v650_v9 = vld [vmem:[#allocation10 + $0x10] sm:$0xff]  ;;  %s2656_s30 = sld [smem:[#allocation21_spill]]  ;;  %s2048_s28 = smov 16  }
  0xf0   : > { %v1580_v8 = vpack.c.bf16 %v552_v7, %v551_v5  ;;  %v651_v10 = vld [vmem:[#allocation10 + $0x18] sm:$0xff]  ;;  %v553_v11 = vld [vmem:[#allocation8 + $0x10] sm:$0xff]  ;;  %v549_v15 = vld [vmem:[%s474_s15] sm:$0xff]  ;;  %s2657_s16 = sld [smem:[#allocation25_spill]]  ;;  %s547_s20 = scalar_lea.vmem [#allocation14], %s2415_s10 }
  0xf1   : > { %1590 = vmatpush3.bf16.xpose.msk.msra.mxu1 %vm2446_vm2, %v1588_v6  ;;  %v554_v12 = vld [vmem:[#allocation8 + $0x18] sm:$0xff]  ;;  %v1592_v13 = vpack.c.bf16 %v651_v10, %v650_v9  ;;  %v1463_v17 = vld [vmem:[%s2583_s8] ss:$0 sm:$0xff]  ;;  %v744_v25 = vld [vmem:[#allocation11] sm:$0xff]  ;;  %s2658_s13 = sld [smem:[#allocation32_spill]]  ;;  %s2659_s15 = sld [smem:[#allocation33_spill]] }
  0xf2   : > { %1582 = vmatpush3.bf16.xpose.msk.msra.mxu0 %vm2446_vm2, %v1580_v8  ;;  %1591 = vmatprep.subr.bf16.mxu1 %v2044_v0  ;;  %v1584_v14 = vpack.c.bf16 %v554_v12, %v553_v11  ;;  %v548_v16 = vld [vmem:[%s465_s27] sm:$0xff]  ;;  %v745_v26 = vld [vmem:[#allocation11 + $0x8] sm:$0xff]  ;;  %v1173_v63 = vld [vmem:[#allocation13] sm:$0xff]  ;;  %s1273_s27 = sshll.u32 %s547_s20, 4  ;;  %s1259_s23 = scalar_lea.sflag [#allocation4], %s2412_s21  ;;  %s2527_s27 = int_to_ptr.vmem [resolvable:$true] %s1273_s27 }
  0xf3   : > { %1583 = vmatprep.subr.bf16.mxu0 %v2044_v0  ;;  %v1457_v18 = vld [vmem:[%s2582_s7] ss:$0 sm:$0xff]  ;;  %v1596_v27 = vpack.c.bf16 %v745_v26, %v744_v25  ;;  %v747_v29 = vld [vmem:[#allocation11 + $0x18] sm:$0xff]  ;;  %s1939_s25 = scalar_lea.vmem %s2527_s27, 128  ;;  %s2049_s10 = smov [#allocation14]  }
  0xf4   : > { %v746_v28 = vld [vmem:[#allocation11 + $0x10] sm:$0xff]  ;;  %v1176_v4 = vld [vmem:[#allocation13 + $0x18] sm:$0xff]  ;;  %p1940_p13 = scmp.ne.s32.totalorder %s2527_s27, %s1939_s25  ;;  %s1943_s14 = sshll.u32 %s2049_s10, 4  ;;  %s1944_s14 = int_to_ptr.vmem [resolvable:$false] %s1943_s14 }
  0xf5   : > { %v1600_v30 = vpack.c.bf16 %v747_v29, %v746_v28  ;;  %v550_v31 = vld [vmem:[%s483_s22] sm:$0xff]  ;;  %s1484_s1 = sshll.u32 %s2656_s30, 7  ;;  %s1945_s11 = scalar_lea.vmem %s1944_s14, 256 }
  0xf6   : > { %v1469_v40 = vld [vmem:[%s2655_s17] ss:$0 sm:$0xff]  ;;  %p2660_p2 = scmp.ne.s32.totalorder %s2657_s16, 0  ;;  %p1946_p8 = scmp.lt.s32.totalorder %s2527_s27, %s1944_s14 }
  0xf7   : > { %v1175_v2 = vld [vmem:[#allocation13 + $0x10] sm:$0xff]  ;;  %s2525_s22 = scalar_lea.hbm %s2659_s15, %s1484_s1  ;;  %p1947_p9 = scmp.lt.s32.totalorder %s1945_s11, %s1939_s25 }
  0xf8   : > { %v1607_v5 = vpack.c.bf16 %v1176_v4, %v1175_v2  ;;  %v1481_v10 = vld [vmem:[%s2658_s13] ss:$0 sm:$0xff]  ;;  %p1941_p1 = pnand %p1940_p13, %p2660_p2 }
  0xf9   : > { %1594 = vmatpush3.bf16.xpose.msk.msra.mxu1 %vm2446_vm2, %v1592_v13  ;;  %p1948_p7 = por %p1947_p9, %p1946_p8 }
  0xfa   : > { %1586 = vmatpush3.bf16.xpose.msk.msra.mxu0 %vm2446_vm2, %v1584_v14  ;;  %1548 = vmatprep.subr.mxu1 %v2046_v1  ;;  %p1942_p12 = pneg %p1941_p1 }
  0xfb   : > { %1595 = vmatprep.subr.bf16.mxu0 %v2044_v0 }
  0xfc   : > { %p1949_p11 = pnand %p1948_p7, %p1942_p12 }
 0x100   : > { %1535 = vmatmul.mubr.msk.f32.vlgmr.msra.gmra.mrb[0].mxu1 %vm562_vm1, %v549_v15 }
 0x101   : > { %1524 = vmatmul.mubr.msk.f32.vlgmr.msra.gmra.mrb[0].mxu0 %vm562_vm1, %v548_v16  ;;  %1550 = vmatprep.mubr.msk.f32.mxu1 %vm2045_vm0, %v2046_v1 }
 0x102   : > { %1545 = vmatprep.mubr.msk.f32.mxu0 %vm2045_vm0, %v2046_v1  ;;  %1598 = vmatpush3.bf16.xpose.msk.msra.mxu0 %vm2446_vm2, %v1596_v27 }
 0x103   : > { %1599 = vmatprep.subr.bf16.mxu0 %v2044_v0 }
 0x10a   : > { %1602 = vmatpush3.bf16.xpose.msk.msra.mxu0 %vm2446_vm2, %v1600_v30 }
 0x10b   : > { %1603 = vmatprep.subr.bf16.mxu0 %v2044_v0 }
 0x111   : > { %1546 = vmatmul.mubr.msk.f32.vlgmr.msra.gmra.mrb[2].mxu0 %vm562_vm1, %v550_v31 }
 0x112   : > { %1576 = vmatprep.mubr.msk.f32.mxu0 %vm2045_vm0, %v2046_v1 }
 0x1d3   : > { %v740_v19 = vpop.f32.mrb[0].mxu1 }
 0x1d4   : > { %v741_v20 = vadd.f32 %v1463_v17, %v740_v19  ;;  %v1536_v21 = vpop.f32.mrb[1].mxu1  ;;  %v644_v22 = vpop.f32.mrb[0].mxu0 }
 0x1d5   : > { %v645_v23 = vadd.f32 %v1457_v18, %v644_v22  ;;  %v1525_v24 = vpop.f32.mrb[1].mxu0 }
 0x1d6   : > { %1004 = vrot.lane.b32.xlu1 %v741_v20, %s2047_s3  ;;  %1549 = vmatpush3.xpose.msk.msra.mxu1 %vm840_vm3, %v741_v20 }
 0x1d7   : > { %1553 = vmatprep.subr.mxu1 %v2046_v1 }
 0x1d9   : > { %1551 = vmatmul.mubr.msk.f32.vlgmr.msra.gmra.mrb[2].mxu1 %vm840_vm3, %v645_v23 }
 0x1da   : > { %1002 = vrot.lane.b32.xlu1 %v645_v23, %s2047_s3  ;;  %1555 = vmatprep.mubr.msk.f32.mxu1 %vm2045_vm0, %v2046_v1 }
 0x1e4   : > { %v836_v41 = vpop.f32.mrb[2].mxu0 }
 0x1e5   : > { %v837_v42 = vadd.f32 %v1469_v40, %v836_v41  ;;  %v1547_v43 = vpop.f32.mrb[3].mxu0 }
 0x1e7   : > { %1554 = vmatpush3.msra.mxu1 %v837_v42 }
 0x1e8   : > { %1558 = vmatprep.subr.mxu1 %v2046_v1 }
 0x248   : > { %v1005_v46 = vpop.permute.xlu1 %1004 }
 0x24c   : > { %v1003_v48 = vpop.permute.xlu1 %1002 }
 0x2ac   : > { %v913_v32 = vpop.f32.mrb[2].mxu1 }
 0x2ad   : > { %v1552_v33 = vpop.f32.mrb[3].mxu1  ;;  %v918_v34 = vsel %vm917_vm4, %v913_v32, -inf }
 0x2ae   : > { %919 = vmax.xlane.f32.xlu0 %v918_v34 }
 0x33b   : > { %v920_v35 = vpop.xlane.xlu0 %919 }
 0x33c   : > { %v921_v36 = vsub.f32 %v913_v32, %v920_v35 }
 0x33e   : > { %v922_v37 = vmul.f32 1.442695, %v921_v36 }
 0x340   : > { %1729 = vpow2.f32 %v922_v37 }
 0x34a   : > { %v1730_v38 = vpop.eup %1729 }
 0x34b   : > { %v924_v39 = vsel %vm917_vm4, %v1730_v38, 0.0 }
 0x34c   : > { %925 = vadd.xlane.f32.xlu0 %v924_v39 }
 0x3d9   : > { %v926_v44 = vpop.xlane.xlu0 %925 }
 0x3da   : > { %1731 = vrcp.f32 %v926_v44 }
 0x3e4   : > { %v1732_v45 = vpop.eup %1731 }
 0x3e5   : > { %v928_v47 = vmul.f32 %v1732_v45, %v1730_v38 }
 0x3e7   : > { %1556 = vmatmul.mubr.msk.f32.vlgmr.msra.gmra.mrb[4].mxu1 %vm917_vm4, %v928_v47 }
 0x3e8   : > { %1559 = vmatpush3.xpose.msk.msra.mxu1 %vm840_vm3, %v1005_v46  ;;  %1560 = vmatprep.mubr.msk.f32.mxu1 %vm2045_vm0, %v2046_v1 }
 0x3e9   : > { %1563 = vmatprep.subr.mxu1 %v2046_v1 }
 0x3eb   : > { %1561 = vmatmul.mubr.msk.f32.vlgmr.msra.gmra.mrb[6].mxu1 %vm840_vm3, %v1003_v48 }
 0x3ec   : > { %1565 = vmatprep.mubr.msk.f32.mxu1 %vm2045_vm0, %v2046_v1  ;;  %v1174_v1 = vld [vmem:[#allocation13 + $0x8] sm:$0xff] }
 0x3ed   : > { %v1604_v3 = vpack.c.bf16 %v1174_v1, %v1173_v63 }
 0x3ef   : > { %1605 = vmatpush3.bf16.msra.mxu0 %v1604_v3 }
 0x3f0   : > { %1606 = vmatprep.subr.bf16.mxu0 %v2044_v0 }
 0x3f3   : > { %1608 = vmatpush3.bf16.msra.mxu0 %v1607_v5 }
 0x4ba   : > { %v998_v49 = vpop.f32.mrb[4].mxu1 }
 0x4bb   : > { %v1557_v50 = vpop.f32.mrb[5].mxu1 }
 0x4be   : > { %v1076_v51 = vpop.f32.mrb[6].mxu1 }
 0x4bf   : > { %v1562_v52 = vpop.f32.mrb[7].mxu1  ;;  %v1080_v53 = vsel %vm917_vm4, %v1076_v51, -inf }
 0x4c0   : > { %1081 = vmax.xlane.f32.xlu0 %v1080_v53 }
 0x4d6   : > { %1092 = vrot.lane.b32.xlu0 %v837_v42, %s2047_s3 }
 0x54d   : > { %v1082_v54 = vpop.xlane.xlu0 %1081 }
 0x54e   : > { %v1083_v55 = vsub.f32 %v1076_v51, %v1082_v54 }
 0x550   : > { %v1084_v56 = vmul.f32 1.442695, %v1083_v55 }
 0x551   : > { %v1093_v57 = vpop.permute.xlu0 %1092 }
 0x552   : > { %1733 = vpow2.f32 %v1084_v56  ;;  %1564 = vmatpush3.msra.mxu1 %v1093_v57 }
 0x55c   : > { %v1734_v58 = vpop.eup %1733 }
 0x55d   : > { %v1086_v59 = vsel %vm917_vm4, %v1734_v58, 0.0 }
 0x55e   : > { %1087 = vadd.xlane.f32.xlu1 %v1086_v59 }
 0x5eb   : > { %v1088_v60 = vpop.xlane.xlu1 %1087 }
 0x5ec   : > { %1735 = vrcp.f32 %v1088_v60 }
 0x5f6   : > { %v1736_v61 = vpop.eup %1735 }
 0x5f7   : > { %v1090_v62 = vmul.f32 %v1736_v61, %v1734_v58 }
 0x5f9   : > { %1566 = vmatmul.mubr.msk.f32.vlgmr.msra.gmra.mrb[8].mxu1 %vm917_vm4, %v1090_v62 }
 0x6cc   : > { %v1164_v6 = vpop.f32.mrb[8].mxu1 }
 0x6cd   : > { %1169 = vrot.lane.b32.xlu0 %v1164_v6, %s2048_s28  ;;  %v1567_v7 = vpop.f32.mrb[9].mxu1 }
 0x73f   : > { %v1170_v8 = vpop.permute.xlu0 %1169 }
 0x740   : > { %v1172_v9 = vsel %vm840_vm3, %v998_v49, %v1170_v8 }
 0x741   : > { %1577 = vmatmul.mubr.msk.f32.vlgmr.msra.gmra.mrb[4].mxu0 %vm562_vm1, %v1172_v9 }
 0x814   : > { %v1253_v0 = vpop.f32.mrb[4].mxu0 }
 0x815   : > { %v1254_v11 = vadd.f32 %v1481_v10, %v1253_v0  ;;  %v1578_v12 = vpop.f32.mrb[5].mxu0 }
 0x817   : > { %1257 = vst.msk [vmem:[%s547_s20] sm:$0xff] %vm562_vm1, %v1254_v11 }
 0x818   : > { %1952 = shalt.err (!%p1949_p11)
}
 0x819   : > { %s1953_s21 = scalar_lea.hbm %s2525_s22, 128  ;;  %s1957_s9 = scalar_lea.hbm %s2659_s15, 256 }
 0x81a   : > { %p1954_p5 = scmp.ne.s32.totalorder %s2525_s22, %s1953_s21  ;;  %p1958_p0 = scmp.lt.u32.totalorder %s2525_s22, %s2659_s15 }
 0x81b   : > { %p1959_p4 = scmp.lt.u32.totalorder %s1957_s9, %s1953_s21  ;;  %p1961_p13 = scmp.lt.u32.totalorder %s1953_s21, %s2525_s22 }
 0x81c   : > { %p1955_p3 = pnand %p1954_p5, %p2660_p2 }
 0x81d   : > { %p1960_p10 = por %p1959_p4, %p1958_p0 }
 0x81e   : > { %p1956_p6 = pneg %p1955_p3 }
 0x81f   : > { %p1962_p1 = por %p1961_p13, %p1960_p10 }
 0x821   : > { %p1963_p12 = pnand %p1962_p1, %p1956_p6 }
 0x823   : > { %1966 = shalt.err (!%p1963_p12)
}
 0x824   : > { %1631 = dma.vmem_to_hbm [thread:$0]  (%p2660_p2), %s2527_s27, 128, %s2525_s22, %s1259_s23  }
 0x825 PF: > { %s2661_s28 = sld [smem:[#allocation20_spill]]  ;;  %s2662_s29 = sld [smem:[#allocation27_spill]] }
 0x826   : > { %s2663_s5 = sld [smem:[#allocation23_spill]] }
 0x82b   : > { %s1285_s13 = sand.u32 1, %s2661_s28   ;;  %p2664_p8 = scmp.ne.s32.totalorder %s2662_s29, 0 }
 0x82c   : > { %p2665_p9 = scmp.ge.s32.totalorder %s2663_s5, 2  ;;  %s1286_s1 = scalar_lea.sflag [#allocation4], %s1285_s13 }
 0x82e   : > { %p1657_p7 = pnand %p2665_p9, %p2664_p8 }
 0x830   : > { %2008 = dma.done.wait (!%p1657_p7), %s1286_s1, 128  }
 0x831   : > { %2010 = vsyncadd (!%p1657_p7), %s1286_s1, 4294967168  ;;  %s32_s22 = sadd.s32 1, %s2663_s5   ;;  %s2666_s16 = sld [smem:[#allocation26_spill]] }
 0x832   : > { %p29_p11 = scmp.ge.s32.totalorder %s32_s22, 4   ;;  %s2667_s20 = sld [smem:[#allocation22_spill]] }
 0x833   : > { %s2668_s21 = sld [smem:[#allocation24_spill]]  ;;  %s2669_s17 = smov %s2017_s18 }
 0x834   : > { %s2670_s18 = smov %s2021_s19  ;;  %31 = sbr.rel (!%p29_p11) target bundleno = 17 (0x11), region = 149 }
 0x837   : > { %s2671_s19 = smov %s2666_s16 }
 0x83b   :  { %1291 = vsyncpa [#allocation3], 1 }
 0x83c   :  { %1293 = vsyncpa [#allocation3 + $0x1], 1 }
 0x83d   :  { %1294 = vsyncpa [#allocation6], 1 }
 0x83e   :  { %1296 = vsyncpa [#allocation6 + $0x1], 1 }
 0x83f   :  { %1297 = vsyncpa [#allocation9], 1 }
 0x840   :  { %1298 = vsyncpa [#allocation12], 1 }
 0x841   :  { %1299 = vsyncpa [#allocation4], 1 }
 0x842   :  { %1301 = vsyncpa [#allocation4 + $0x1], 1 }

// kernel: tpu_custom_call.1
= control target key start
LH: loop header
LB: loop body
LE: loop exit
PB: predicated region body
PF: predicated region fallthrough
CT: control target
= control target key end

     0   :  { %s2575_s0 = inlined_call_operand.hbm [shape: f32[2,8,32], index: 0, kind: input, shape index: {}]   ;;  %s2576_s1 = inlined_call_operand.hbm [shape: f32[2,8,32], index: 1, kind: input, shape index: {}]   ;;  %s2577_s2 = inlined_call_operand.hbm [shape: f32[2,8,32], index: 2, kind: input, shape index: {}]   ;;  %s2578_s3 = inlined_call_operand.hbm [shape: f32[32,32], index: 3, kind: input, shape index: {}]   ;;  %s2579_s4 = inlined_call_operand.hbm [shape: f32[32,32], index: 4, kind: input, shape index: {}]   ;;  %s2580_s5 = inlined_call_operand.hbm [shape: f32[32,32], index: 5, kind: input, shape index: {}]   ;;  %s2581_s6 = inlined_call_operand.hbm [shape: f32[32,32], index: 6, kind: input, shape index: {}]   ;;  %s2582_s7 = inlined_call_operand.vmem [shape: f32[1,32], index: 7, kind: input, shape index: {}]   ;;  %s2583_s8 = inlined_call_operand.vmem [shape: f32[1,32], index: 8, kind: input, shape index: {}]   ;;  %s2584_s9 = inlined_call_operand.vmem [shape: f32[1,32], index: 9, kind: input, shape index: {}]   ;;  %s2585_s10 = inlined_call_operand.vmem [shape: f32[1,32], index: 10, kind: input, shape index: {}]   ;;  %s2586_s11 = inlined_call_operand.hbm [shape: f32[2,8,32], index: 11, kind: output, shape index: {}]  }
   0x1   :  { %2613 = sst [smem:[#allocation28_spill]] %s2576_s1 }
   0x2   :  { %2614 = sst [smem:[#allocation29_spill]] %s2578_s3 }
   0x3   :  { %2615 = sst [smem:[#allocation30_spill]] %s2580_s5 }
   0x4   :  { %2616 = sst [smem:[#allocation31_spill]] %s2584_s9 }
   0x5   :  { %2617 = sst [smem:[#allocation32_spill]] %s2585_s10 }
   0x6   :  { %2618 = sst [smem:[#allocation33_spill]] %s2586_s11 }
   0x7   :  { %16 = vsyncpa [#allocation3], 0 }
   0x8   :  { %18 = vsyncpa [#allocation3 + $0x1], 0 }
   0x9   :  { %19 = vsyncpa [#allocation6], 0 }
   0xa   :  { %21 = vsyncpa [#allocation6 + $0x1], 0 }
   0xb   :  { %22 = vsyncpa [#allocation9], 0 }
   0xc   :  { %23 = vsyncpa [#allocation12], 0 }
   0xd   :  { %24 = vsyncpa [#allocation4], 0 }
   0xe   :  { %26 = vsyncpa [#allocation4 + $0x1], 0  ;;  %s2110_s17 = smov 0   ;;  %s2112_s18 = smov 0  }
   0xf   :  { %s2114_s19 = smov 0   ;;  %s2116_s20 = smov 0  }
  0x10   :  { %s2118_s21 = smov 0   ;;  %s2120_s22 = smov 0  }
  0x11 LB: > { %2619 = sst [smem:[#allocation20_spill]] %s2013_s17  ;;  %s2141_s23 = sadd.s32 4294967295, %s2033_s22   ;;  %s2033_s22 = sphi %s2120_s22, %s32_s22   ;;  %s2029_s21 = sphi %s2118_s21, %s2668_s21   ;;  %s2025_s20 = sphi %s2116_s20, %s2667_s20   ;;  %s2021_s19 = sphi %s2114_s19, %s2671_s19   ;;  %s2017_s18 = sphi %s2112_s18, %s2670_s18   ;;  %s2013_s17 = sphi %s2110_s17, %s2669_s17  }
  0x12   : > { %2620 = sst [smem:[#allocation21_spill]] %s2025_s20  ;;  %p1436_p0 = scmp.ge.s32.totalorder %s2033_s22, 1 }
  0x13   : > { %2621 = sst [smem:[#allocation22_spill]] %s2029_s21  ;;  %p2597_p1 = scmp.eq.s32.totalorder %s2141_s23, 0 }
  0x14   : > { %2622 = sst [smem:[#allocation23_spill]] %s2033_s22  ;;  %p325_p2 = scmp.lt.s32.totalorder %s2033_s22, 3 }
  0x15   : > { %s2035_s25 = smov [#allocation8]   ;;  %s2036_s28 = smov [#allocation11]  }
  0x16   : > { %p2146_p3 = pnand %p1436_p0, %p325_p2  ;;  %s337_s26 = sshll.u32 %s2035_s25, 4  ;;  %s2150_s26 = int_to_ptr.vmem [resolvable:$true] %s337_s26 }
  0x17   : > { %s363_s29 = sshll.u32 %s2036_s28, 4  ;;  %s2625_s3 = sld [smem:[#allocation29_spill]]  ;;  %s2161_s29 = int_to_ptr.vmem [resolvable:$true] %s363_s29 }
  0x18   : > { %s2623_s24 = scalar_select %p2146_p3, 1, 0 }
  0x19   : > { %p1633_p4 = pneg %p2146_p3 }
  0x1b   : > { %p2157_p6 = pnand %p1633_p4, %p2597_p1 }
  0x1d   : > { %s2624_s27 = scalar_select %p2157_p6, 1, 0 }
  0x1e   : > { %s1737_s13 = scalar_lea.hbm %s2625_s3, 512  ;;  %p2171_p8 = pneg %p2157_p6 }
  0x1f   : > { %p1738_p7 = scmp.ne.s32.totalorder %s2625_s3, %s1737_s13  ;;  %p1744_p11 = scmp.lt.u32.totalorder %s1737_s13, %s2625_s3 }
  0x20   : > { %s2626_s16 = scalar_select %p2171_p8, 1, 0 }
  0x21   : > { %p1740_p9 = pnand %p2171_p8, %p1738_p7 }
  0x23   : > { %p1741_p10 = pneg %p1740_p9 }
  0x25   : > { %p1746_p12 = pnand %p1744_p11, %p1741_p10 }
  0x27   : > { %1749 = shalt.err (!%p1746_p12)
}
  0x28   : > { %s1750_s30 = scalar_lea.vmem %s2150_s26, 512  ;;  %p1758_p4 = scmp.lt.s32.totalorder %s2150_s26, %s2150_s26 }
  0x29   : > { %p1751_p13 = scmp.ne.s32.totalorder %s2150_s26, %s1750_s30  ;;  %p1759_p5 = scmp.lt.s32.totalorder %s1750_s30, %s1750_s30 }
  0x2b   : > { %p1753_p0 = pnand %p1751_p13, %p2171_p8  ;;  %p1760_p7 = por %p1759_p5, %p1758_p4 }
  0x2d   : > { %p1754_p2 = pneg %p1753_p0 }
  0x2f   : > { %p1761_p9 = pnand %p1760_p7, %p1754_p2 }
  0x31   : > { %1764 = shalt.err (!%p1761_p9)
}
  0x32   : > { %s2588_s12 = smov 128   ;;  %s2590_s13 = smov 8  }
  0x33   : > { %1636 = dma.hbm_to_vmem [thread:$0]  (!%p2157_p6), %s2625_s3, 512, %s2150_s26, [#allocation9], %s2588_s12, %s2588_s12, %s2590_s13  }
  0x34   : > { %s2627_s5 = sld [smem:[#allocation30_spill]] }
  0x3a   : > { %s1765_s30 = scalar_lea.hbm %s2627_s5, 512 }
  0x3b   : > { %p1766_p5 = scmp.ne.s32.totalorder %s2627_s5, %s1765_s30  ;;  %p1772_p12 = scmp.lt.u32.totalorder %s1765_s30, %s2627_s5 }
  0x3d   : > { %p1768_p10 = pnand %p1766_p5, %p2171_p8 }
  0x3f   : > { %p1769_p11 = pneg %p1768_p10 }
  0x41   : > { %p1774_p13 = pnand %p1772_p12, %p1769_p11 }
  0x43   : > { %1777 = shalt.err (!%p1774_p13)
}
  0x44   : > { %s1778_s26 = scalar_lea.vmem %s2161_s29, 512  ;;  %p1786_p7 = scmp.lt.s32.totalorder %s2161_s29, %s2161_s29 }
  0x45   : > { %p1779_p0 = scmp.ne.s32.totalorder %s2161_s29, %s1778_s26  ;;  %p1787_p9 = scmp.lt.s32.totalorder %s1778_s26, %s1778_s26 }
  0x47   : > { %p1781_p2 = pnand %p1779_p0, %p2171_p8  ;;  %p1788_p5 = por %p1787_p9, %p1786_p7 }
  0x49   : > { %p1782_p4 = pneg %p1781_p2 }
  0x4b   : > { %p1789_p10 = pnand %p1788_p5, %p1782_p4 }
  0x4d   : > { %1792 = shalt.err (!%p1789_p10)
}
  0x4e   : > { %1642 = dma.hbm_to_vmem [thread:$0]  (!%p2157_p6), %s2627_s5, 512, %s2161_s29, [#allocation12], %s2588_s12, %s2588_s12, %s2590_s13  }
  0x4f   : > { %s1435_s11 = sadd.s32 4294967294, %s2033_s22   ;;  %s44_s20 = sadd.s32 1, %s2029_s21 }
  0x50   : > { %p46_p11 = scmp.ge.s32.totalorder %s44_s20, 2  ;;  %s53_s14 = sadd.s32 1, %s2021_s19 }
  0x51   : > { %p60_p12 = scmp.ne.s32.totalorder %s2021_s19, %s2017_s18  ;;  %p61_p13 = scmp.eq.s32.totalorder %s2033_s22, 0 }
  0x52   : > { %s2673_s20 = smov (%p46_p11, %s44_s20), 0  ;;  %p66_p2 = scmp.ne.s32.totalorder %s2017_s18, %s2013_s17 }
  0x53   : > { %2628 = sst [smem:[#allocation24_spill]] %s2673_s20  ;;  %p2229_p0 = por %p61_p13, %p60_p12 }
  0x54   : > { %s48_s29 = ssub.s32 %s2029_s21, %s2673_s20  ;;  %p312_p4 = scmp.eq.s32.totalorder %s2141_s23, 1 }
  0x55   : > { %p51_p7 = scmp.eq.s32.totalorder %s48_s29, 0  ;;  %p2240_p9 = por %p2597_p1, %p66_p2 }
  0x56   : > { %p2244_p5 = por %p312_p4, %p60_p12  ;;  %p318_p10 = scmp.eq.s32.totalorder %s1435_s11, 1 }
  0x57   : > { %s2630_s25 = scalar_select %p2240_p9, 1, 0 }
  0x58   : > { %s2631_s28 = scalar_select %p2244_p5, 1, 0 }
  0x59   : > { %s2249_s30 = scalar_select %p51_p7, %s2021_s19, %s53_s14  }
  0x5a   : > { %2632 = sst [smem:[#allocation25_spill]] %s2631_s28  ;;  %p2251_p11 = por %p318_p10, %p66_p2 }
  0x5b   : > { %2633 = sst [smem:[#allocation26_spill]] %s2249_s30  ;;  %p1664_p13 = scmp.lt.s32.totalorder %s2033_s22, 2 }
  0x5c   : > { %s2634_s26 = scalar_select %p2251_p11, 1, 0 }
  0x5d   : > { %s2592_s9 = sand.u32 1, %s2021_s19   ;;  %s2258_s10 = sshll.u32 %s2029_s21, 7 }
  0x5e   : > { %2635 = sst [smem:[#allocation27_spill]] %s2634_s26  ;;  %s2262_s29 = sshll.u32 %s2592_s9, 3 }
  0x5f   : > { %p2266_p12 = pnand %p1664_p13, %p2229_p0  ;;  %s421_s11 = sand.u32 1, %s2033_s22  }
  0x60   : > { %s2637_s1 = sld [smem:[#allocation28_spill]]  ;;  %s425_s5 = scalar_lea.vmem [#allocation5], %s2262_s29 }
  0x61   : > { %s2636_s12 = scalar_select %p2266_p12, 1, 0 }
  0x62   : > { %s432_s9 = sshll.u32 %s425_s5, 4  ;;  %s2280_s15 = scalar_lea.sflag [#allocation6], %s421_s11  ;;  %s2278_s9 = int_to_ptr.vmem [resolvable:$true] %s432_s9 }
  0x63   : > { %p2286_p2 = pneg %p2266_p12 }
  0x65   : > { %s2638_s21 = scalar_select %p2286_p2, 1, 0 }
  0x66   : > { %s2275_s3 = scalar_lea.hbm %s2637_s1, %s2258_s10  ;;  %s1798_s30 = scalar_lea.hbm %s2637_s1, 256 }
  0x67   : > { %s1793_s20 = scalar_lea.hbm %s2275_s3, 128  ;;  %p1799_p10 = scmp.lt.u32.totalorder %s2275_s3, %s2637_s1 }
  0x68   : > { %p1794_p0 = scmp.ne.s32.totalorder %s2275_s3, %s1793_s20  ;;  %p1800_p13 = scmp.lt.u32.totalorder %s1798_s30, %s1793_s20 }
  0x69   : > { %p1802_p11 = scmp.lt.u32.totalorder %s1793_s20, %s2275_s3 }
  0x6a   : > { %p1796_p4 = pnand %p2286_p2, %p1794_p0  ;;  %p1801_p1 = por %p1800_p13, %p1799_p10 }
  0x6c   : > { %p1797_p7 = pneg %p1796_p4  ;;  %p1803_p5 = por %p1802_p11, %p1801_p1 }
  0x6e   : > { %p1804_p9 = pnand %p1803_p5, %p1797_p7 }
  0x70   : > { %1807 = shalt.err (!%p1804_p9)
}
  0x71   : > { %s1808_s11 = scalar_lea.vmem %s2278_s9, 128  ;;  %s2039_s13 = smov [#allocation5]  }
  0x72   : > { %p1809_p0 = scmp.ne.s32.totalorder %s2278_s9, %s1808_s11  ;;  %s1813_s14 = sshll.u32 %s2039_s13, 4  ;;  %s1814_s14 = int_to_ptr.vmem [resolvable:$false] %s1813_s14 }
  0x73   : > { %s1815_s22 = scalar_lea.vmem %s1814_s14, 256  ;;  %p1816_p6 = scmp.lt.s32.totalorder %s2278_s9, %s1814_s14 }
  0x74   : > { %p1811_p4 = pnand %p1809_p0, %p2286_p2  ;;  %p1817_p8 = scmp.lt.s32.totalorder %s1815_s22, %s1808_s11 }
  0x76   : > { %p1812_p3 = pneg %p1811_p4  ;;  %p1818_p10 = por %p1817_p8, %p1816_p6 }
  0x78   : > { %p1819_p13 = pnand %p1818_p10, %p1812_p3 }
  0x7a   : > { %1822 = shalt.err (!%p1819_p13)
}
  0x7b   : > { %1652 = dma.hbm_to_vmem [thread:$0]  (!%p2266_p12), %s2275_s3, 128, %s2278_s9, %s2280_s15  }
  0x7c   : > { %s2040_s20 = smov [#allocation10]   ;;  %s2041_s5 = smov [#allocation13]  }
  0x7d   : > { %s350_s30 = sshll.u32 %s2040_s20, 4  ;;  %s376_s1 = sshll.u32 %s2041_s5, 4  ;;  %s351_s30 = int_to_ptr.vmem [resolvable:$true] %s350_s30  ;;  %s377_s1 = int_to_ptr.vmem [resolvable:$true] %s376_s1 }
  0x7e   : > { %s1823_s14 = scalar_lea.hbm %s2579_s4, 512  ;;  %p2639_p3 = scmp.ne.s32.totalorder %s2626_s16, 0 }
  0x7f   : > { %p1824_p1 = scmp.ne.s32.totalorder %s2579_s4, %s1823_s14  ;;  %p1830_p9 = scmp.lt.u32.totalorder %s1823_s14, %s2579_s4 }
  0x81   : > { %p1826_p6 = pnand %p1824_p1, %p2639_p3 }
  0x83   : > { %p1827_p8 = pneg %p1826_p6 }
  0x85   : > { %p1832_p5 = pnand %p1830_p9, %p1827_p8 }
  0x87   : > { %1835 = shalt.err (!%p1832_p5)
}
  0x88   : > { %s1836_s3 = scalar_lea.vmem %s351_s30, 512  ;;  %p1844_p4 = scmp.lt.s32.totalorder %s351_s30, %s351_s30 }
  0x89   : > { %p1837_p11 = scmp.ne.s32.totalorder %s351_s30, %s1836_s3  ;;  %p1845_p10 = scmp.lt.s32.totalorder %s1836_s3, %s1836_s3 }
  0x8b   : > { %p1839_p7 = pnand %p1837_p11, %p2639_p3  ;;  %p1846_p13 = por %p1845_p10, %p1844_p4 }
  0x8d   : > { %p1840_p0 = pneg %p1839_p7 }
  0x8f   : > { %p1847_p12 = pnand %p1846_p13, %p1840_p0 }
  0x91   : > { %1850 = shalt.err (!%p1847_p12)
}
  0x92   : > { %p2640_p1 = scmp.ne.s32.totalorder %s2624_s27, 0  ;;  %s2641_s26 = smov 8  }
  0x93   : > { %s2642_s9 = smov 128   ;;  %s1851_s13 = scalar_lea.hbm %s2581_s6, 512 }
  0x94   : > { %1639 = dma.hbm_to_vmem [thread:$0]  (!%p2640_p1), %s2579_s4, 512, %s351_s30, [#allocation9], %s2642_s9, %s2642_s9, %s2641_s26  }
  0x95   : > { %p1852_p6 = scmp.ne.s32.totalorder %s2581_s6, %s1851_s13  ;;  %p1858_p9 = scmp.lt.u32.totalorder %s1851_s13, %s2581_s6 }
  0x97   : > { %p1854_p12 = pnand %p1852_p6, %p2639_p3 }
  0x99   : > { %p1855_p8 = pneg %p1854_p12 }
  0x9b   : > { %p1860_p5 = pnand %p1858_p9, %p1855_p8 }
  0x9d   : > { %1863 = shalt.err (!%p1860_p5)
}
  0x9e   : > { %s1864_s17 = scalar_lea.vmem %s377_s1, 512  ;;  %p1872_p4 = scmp.lt.s32.totalorder %s377_s1, %s377_s1 }
  0x9f   : > { %p1865_p11 = scmp.ne.s32.totalorder %s377_s1, %s1864_s17  ;;  %p1873_p10 = scmp.lt.s32.totalorder %s1864_s17, %s1864_s17 }
  0xa1   : > { %p1867_p7 = pnand %p1865_p11, %p2639_p3  ;;  %p1874_p13 = por %p1873_p10, %p1872_p4 }
  0xa3   : > { %p1868_p0 = pneg %p1867_p7 }
  0xa5   : > { %p1875_p2 = pnand %p1874_p13, %p1868_p0 }
  0xa7   : > { %1878 = shalt.err (!%p1875_p2)
}
  0xa8   : > { %1645 = dma.hbm_to_vmem [thread:$0]  (!%p2640_p1), %s2581_s6, 512, %s377_s1, [#allocation12], %s2642_s9, %s2642_s9, %s2641_s26  }
  0xa9   : > { %s2356_s5 = scalar_lea.hbm %s2575_s0, %s2258_s10  ;;  %s406_s27 = scalar_lea.vmem [#allocation2], %s2262_s29 }
  0xaa   : > { %s414_s13 = sshll.u32 %s406_s27, 4  ;;  %s2365_s22 = scalar_lea.hbm %s2577_s2, %s2258_s10  ;;  %s2359_s13 = int_to_ptr.vmem [resolvable:$true] %s414_s13 }
  0xab   : > { %s2643_s3 = sand.u32 1, %s2021_s19   ;;  %s1879_s26 = scalar_lea.hbm %s2356_s5, 128 }
  0xac   : > { %s403_s1 = scalar_lea.sflag [#allocation3], %s2643_s3  ;;  %p1880_p2 = scmp.ne.s32.totalorder %s2356_s5, %s1879_s26 }
  0xad   : > { %p2644_p3 = scmp.ne.s32.totalorder %s2638_s21, 0  ;;  %s1884_s30 = scalar_lea.hbm %s2575_s0, 256 }
  0xae   : > { %p1885_p12 = scmp.lt.u32.totalorder %s2356_s5, %s2575_s0  ;;  %p1886_p8 = scmp.lt.u32.totalorder %s1884_s30, %s1879_s26 }
  0xaf   : > { %p1882_p1 = pnand %p1880_p2, %p2644_p3  ;;  %p1888_p5 = scmp.lt.u32.totalorder %s1879_s26, %s2356_s5 }
  0xb0   : > { %p1887_p9 = por %p1886_p8, %p1885_p12 }
  0xb1   : > { %p1883_p6 = pneg %p1882_p1 }
  0xb2   : > { %p1889_p11 = por %p1888_p5, %p1887_p9 }
  0xb4   : > { %p1890_p7 = pnand %p1889_p11, %p1883_p6 }
  0xb6   : > { %1893 = shalt.err (!%p1890_p7)
}
  0xb7   : > { %s1894_s10 = scalar_lea.vmem %s2359_s13, 128  ;;  %s2042_s20 = smov [#allocation2]  }
  0xb8   : > { %p1895_p0 = scmp.ne.s32.totalorder %s2359_s13, %s1894_s10  ;;  %s1899_s27 = sshll.u32 %s2042_s20, 4  ;;  %s1900_s27 = int_to_ptr.vmem [resolvable:$false] %s1899_s27 }
  0xb9   : > { %s1901_s14 = scalar_lea.vmem %s1900_s27, 256  ;;  %p1902_p13 = scmp.lt.s32.totalorder %s2359_s13, %s1900_s27 }
  0xba   : > { %p1897_p4 = pnand %p1895_p0, %p2644_p3  ;;  %p1903_p2 = scmp.lt.s32.totalorder %s1901_s14, %s1894_s10 }
  0xbc   : > { %p1898_p10 = pneg %p1897_p4  ;;  %p1904_p1 = por %p1903_p2, %p1902_p13 }
  0xbe   : > { %p1905_p12 = pnand %p1904_p1, %p1898_p10 }
  0xc0   : > { %1908 = shalt.err (!%p1905_p12)
}
  0xc1   : > { %p2645_p6 = scmp.ne.s32.totalorder %s2636_s12, 0  ;;  %s443_s11 = scalar_lea.vmem [#allocation7], %s2262_s29 }
  0xc2   : > { %s450_s3 = sshll.u32 %s443_s11, 4  ;;  %s1909_s26 = scalar_lea.hbm %s2365_s22, 128  ;;  %s451_s3 = int_to_ptr.vmem [resolvable:$true] %s450_s3 }
  0xc3   : > { %1649 = dma.hbm_to_vmem [thread:$0]  (!%p2645_p6), %s2356_s5, 128, %s2359_s13, %s403_s1  }
  0xc4   : > { %p1910_p8 = scmp.ne.s32.totalorder %s2365_s22, %s1909_s26  ;;  %s1914_s30 = scalar_lea.hbm %s2577_s2, 256 }
  0xc5   : > { %p1915_p11 = scmp.lt.u32.totalorder %s2365_s22, %s2577_s2  ;;  %p1916_p7 = scmp.lt.u32.totalorder %s1914_s30, %s1909_s26 }
  0xc6   : > { %p1912_p9 = pnand %p1910_p8, %p2644_p3  ;;  %p1918_p4 = scmp.lt.u32.totalorder %s1909_s26, %s2365_s22 }
  0xc7   : > { %p1917_p0 = por %p1916_p7, %p1915_p11 }
  0xc8   : > { %p1913_p5 = pneg %p1912_p9 }
  0xc9   : > { %p1919_p10 = por %p1918_p4, %p1917_p0 }
  0xcb   : > { %p1920_p13 = pnand %p1919_p10, %p1913_p5 }
  0xcd   : > { %1923 = shalt.err (!%p1920_p13)
}
  0xce   : > { %s1924_s29 = scalar_lea.vmem %s451_s3, 128  ;;  %s2043_s5 = smov [#allocation7]  }
  0xcf   : > { %p1925_p2 = scmp.ne.s32.totalorder %s451_s3, %s1924_s29  ;;  %s1929_s13 = sshll.u32 %s2043_s5, 4  ;;  %s1930_s13 = int_to_ptr.vmem [resolvable:$false] %s1929_s13 }
  0xd0   : > { %s1931_s1 = scalar_lea.vmem %s1930_s13, 256  ;;  %p1932_p8 = scmp.lt.s32.totalorder %s451_s3, %s1930_s13 }
  0xd1   : > { %p1927_p1 = pnand %p1925_p2, %p2644_p3  ;;  %p1933_p9 = scmp.lt.s32.totalorder %s1931_s1, %s1924_s29 }
  0xd3   : > { %p1928_p12 = pneg %p1927_p1  ;;  %p1934_p6 = por %p1933_p9, %p1932_p8 }
  0xd5   : > { %p1935_p7 = pnand %p1934_p6, %p1928_p12 }
  0xd7   : > { %1938 = shalt.err (!%p1935_p7)
}
  0xd8   : > { %p2646_p11 = scmp.ne.s32.totalorder %s2636_s12, 0  ;;  %p2647_p5 = scmp.ne.s32.totalorder %s2623_s24, 0 }
  0xd9   : > { %s2412_s21 = sand.u32 (!%p2647_p5), 1, %s2017_s18   ;;  %p2648_p3 = scmp.ne.s32.totalorder (!%p2647_p5), %s2630_s25, 0 }
  0xda   : > { %1655 = dma.hbm_to_vmem [thread:$0]  (!%p2646_p11), %s2365_s22, 128, %s451_s3, %s2280_s15  }
  0xdb   : > { %459 = sbr.rel (%p2647_p5) target bundleno = 2085 (0x825), region = 64  ;;  %s2415_s10 = sshll.u32 (!%p2647_p5), %s2412_s21, 3 }
  0xdc   : > { %s462_s20 = scalar_lea.sflag (!%p2647_p5), [#allocation3], %s2412_s21  ;;  %s465_s27 = scalar_lea.vmem (!%p2647_p5), [#allocation2], %s2415_s10 }
  0xe2   : > { %1992 = dma.done.wait (%p2648_p3), %s462_s20, 128  }
  0xe3   : > { %1994 = vsyncadd (%p2648_p3), %s462_s20, 4294967168  ;;  %s470_s24 = sand.u32 1, %s2141_s23   ;;  %s474_s15 = scalar_lea.vmem [#allocation5], %s2415_s10 }
  0xe4   : > { %s471_s12 = scalar_lea.sflag [#allocation6], %s470_s24 }
  0xe5   : > { %1996 = dma.done.wait (%p2648_p3), %s471_s12, 256  }
  0xe6   : > { %1998 = vsyncadd (%p2648_p3), %s471_s12, 4294967040  ;;  %s483_s22 = scalar_lea.vmem [#allocation7], %s2415_s10  ;;  %p2649_p6 = scmp.eq.s32.totalorder %s2141_s23, 0 }
  0xe8   : > { %2000 = dma.done.wait (%p2649_p6), [#allocation9], 1024   ;;  %p2650_p0 = pmov %p2649_p6 }
  0xea   : > { %2002 = vsyncadd (%p2650_p0), [#allocation9], 4294966272  ;;  %p2651_p4 = pmov %p2650_p0 }
  0xeb   : > { %p2652_p10 = pmov %p2650_p0 }
  0xec   : > { %2004 = dma.done.wait (%p2651_p4), [#allocation12], 1024  }
  0xed   : > { %2006 = vsyncadd (%p2652_p10), [#allocation12], 4294966272  ;;  %v2044_v0 = vmov 0.0|0.0   ;;  %vm2045_vm0 = vmmov 0   ;;  %v2046_v1 = vmov 0.0   ;;  %vm562_vm1 = vcmask 261120  }
  0xee   : > { %1587 = vmatprep.subr.bf16.mxu1 %v2044_v0  ;;  %1579 = vmatprep.subr.bf16.mxu0 %v2044_v0  ;;  %vm2446_vm2 = vmpackc.low %vm562_vm1, %vm562_vm1  ;;  %v648_v3 = vld [vmem:[#allocation10] sm:$0xff]  ;;  %v649_v4 = vld [vmem:[#allocation10 + $0x8] sm:$0xff]  ;;  %vm840_vm3 = vcmask 130048   ;;  %s2047_s3 = smov 112   ;;  %vm917_vm4 = vcmask 64512   ;;  %s2655_s17 = sld [smem:[#allocation31_spill]] }
  0xef   : > { %1534 = vmatprep.mubr.msk.f32.mxu1 %vm2045_vm0, %v2046_v1  ;;  %1523 = vmatprep.mubr.msk.f32.mxu0 %vm2045_vm0, %v2046_v1  ;;  %v551_v5 = vld [vmem:[#allocation8] sm:$0xff]  ;;  %v1588_v6 = vpack.c.bf16 %v649_v4, %v648_v3  ;;  %v552_v7 = vld [vmem:[#allocation8 + $0x8] sm:$0xff]  ;;  %v650_v9 = vld [vmem:[#allocation10 + $0x10] sm:$0xff]  ;;  %s2656_s30 = sld [smem:[#allocation21_spill]]  ;;  %s2048_s28 = smov 16  }
  0xf0   : > { %v1580_v8 = vpack.c.bf16 %v552_v7, %v551_v5  ;;  %v651_v10 = vld [vmem:[#allocation10 + $0x18] sm:$0xff]  ;;  %v553_v11 = vld [vmem:[#allocation8 + $0x10] sm:$0xff]  ;;  %v549_v15 = vld [vmem:[%s474_s15] sm:$0xff]  ;;  %s2657_s16 = sld [smem:[#allocation25_spill]]  ;;  %s547_s20 = scalar_lea.vmem [#allocation14], %s2415_s10 }
  0xf1   : > { %1590 = vmatpush3.bf16.xpose.msk.msra.mxu1 %vm2446_vm2, %v1588_v6  ;;  %v554_v12 = vld [vmem:[#allocation8 + $0x18] sm:$0xff]  ;;  %v1592_v13 = vpack.c.bf16 %v651_v10, %v650_v9  ;;  %v1463_v17 = vld [vmem:[%s2583_s8] ss:$0 sm:$0xff]  ;;  %v744_v25 = vld [vmem:[#allocation11] sm:$0xff]  ;;  %s2658_s13 = sld [smem:[#allocation32_spill]]  ;;  %s2659_s15 = sld [smem:[#allocation33_spill]] }
  0xf2   : > { %1582 = vmatpush3.bf16.xpose.msk.msra.mxu0 %vm2446_vm2, %v1580_v8  ;;  %1591 = vmatprep.subr.bf16.mxu1 %v2044_v0  ;;  %v1584_v14 = vpack.c.bf16 %v554_v12, %v553_v11  ;;  %v548_v16 = vld [vmem:[%s465_s27] sm:$0xff]  ;;  %v745_v26 = vld [vmem:[#allocation11 + $0x8] sm:$0xff]  ;;  %v1173_v63 = vld [vmem:[#allocation13] sm:$0xff]  ;;  %s1273_s27 = sshll.u32 %s547_s20, 4  ;;  %s1259_s23 = scalar_lea.sflag [#allocation4], %s2412_s21  ;;  %s2527_s27 = int_to_ptr.vmem [resolvable:$true] %s1273_s27 }
  0xf3   : > { %1583 = vmatprep.subr.bf16.mxu0 %v2044_v0  ;;  %v1457_v18 = vld [vmem:[%s2582_s7] ss:$0 sm:$0xff]  ;;  %v1596_v27 = vpack.c.bf16 %v745_v26, %v744_v25  ;;  %v747_v29 = vld [vmem:[#allocation11 + $0x18] sm:$0xff]  ;;  %s1939_s25 = scalar_lea.vmem %s2527_s27, 128  ;;  %s2049_s10 = smov [#allocation14]  }
  0xf4   : > { %v746_v28 = vld [vmem:[#allocation11 + $0x10] sm:$0xff]  ;;  %v1176_v4 = vld [vmem:[#allocation13 + $0x18] sm:$0xff]  ;;  %p1940_p13 = scmp.ne.s32.totalorder %s2527_s27, %s1939_s25  ;;  %s1943_s14 = sshll.u32 %s2049_s10, 4  ;;  %s1944_s14 = int_to_ptr.vmem [resolvable:$false] %s1943_s14 }
  0xf5   : > { %v1600_v30 = vpack.c.bf16 %v747_v29, %v746_v28  ;;  %v550_v31 = vld [vmem:[%s483_s22] sm:$0xff]  ;;  %s1484_s1 = sshll.u32 %s2656_s30, 7  ;;  %s1945_s11 = scalar_lea.vmem %s1944_s14, 256 }
  0xf6   : > { %v1469_v40 = vld [vmem:[%s2655_s17] ss:$0 sm:$0xff]  ;;  %p2660_p2 = scmp.ne.s32.totalorder %s2657_s16, 0  ;;  %p1946_p8 = scmp.lt.s32.totalorder %s2527_s27, %s1944_s14 }
  0xf7   : > { %v1175_v2 = vld [vmem:[#allocation13 + $0x10] sm:$0xff]  ;;  %s2525_s22 = scalar_lea.hbm %s2659_s15, %s1484_s1  ;;  %p1947_p9 = scmp.lt.s32.totalorder %s1945_s11, %s1939_s25 }
  0xf8   : > { %v1607_v5 = vpack.c.bf16 %v1176_v4, %v1175_v2  ;;  %v1481_v10 = vld [vmem:[%s2658_s13] ss:$0 sm:$0xff]  ;;  %p1941_p1 = pnand %p1940_p13, %p2660_p2 }
  0xf9   : > { %1594 = vmatpush3.bf16.xpose.msk.msra.mxu1 %vm2446_vm2, %v1592_v13  ;;  %p1948_p7 = por %p1947_p9, %p1946_p8 }
  0xfa   : > { %1586 = vmatpush3.bf16.xpose.msk.msra.mxu0 %vm2446_vm2, %v1584_v14  ;;  %1548 = vmatprep.subr.mxu1 %v2046_v1  ;;  %p1942_p12 = pneg %p1941_p1 }
  0xfb   : > { %1595 = vmatprep.subr.bf16.mxu0 %v2044_v0 }
  0xfc   : > { %p1949_p11 = pnand %p1948_p7, %p1942_p12 }
 0x100   : > { %1535 = vmatmul.mubr.msk.f32.vlgmr.msra.gmra.mrb[0].mxu1 %vm562_vm1, %v549_v15 }
 0x101   : > { %1524 = vmatmul.mubr.msk.f32.vlgmr.msra.gmra.mrb[0].mxu0 %vm562_vm1, %v548_v16  ;;  %1550 = vmatprep.mubr.msk.f32.mxu1 %vm2045_vm0, %v2046_v1 }
 0x102   : > { %1545 = vmatprep.mubr.msk.f32.mxu0 %vm2045_vm0, %v2046_v1  ;;  %1598 = vmatpush3.bf16.xpose.msk.msra.mxu0 %vm2446_vm2, %v1596_v27 }
 0x103   : > { %1599 = vmatprep.subr.bf16.mxu0 %v2044_v0 }
 0x10a   : > { %1602 = vmatpush3.bf16.xpose.msk.msra.mxu0 %vm2446_vm2, %v1600_v30 }
 0x10b   : > { %1603 = vmatprep.subr.bf16.mxu0 %v2044_v0 }
 0x111   : > { %1546 = vmatmul.mubr.msk.f32.vlgmr.msra.gmra.mrb[2].mxu0 %vm562_vm1, %v550_v31 }
 0x112   : > { %1576 = vmatprep.mubr.msk.f32.mxu0 %vm2045_vm0, %v2046_v1 }
 0x1d3   : > { %v740_v19 = vpop.f32.mrb[0].mxu1 }
 0x1d4   : > { %v741_v20 = vadd.f32 %v1463_v17, %v740_v19  ;;  %v1536_v21 = vpop.f32.mrb[1].mxu1  ;;  %v644_v22 = vpop.f32.mrb[0].mxu0 }
 0x1d5   : > { %v645_v23 = vadd.f32 %v1457_v18, %v644_v22  ;;  %v1525_v24 = vpop.f32.mrb[1].mxu0 }
 0x1d6   : > { %1004 = vrot.lane.b32.xlu1 %v741_v20, %s2047_s3  ;;  %1549 = vmatpush3.xpose.msk.msra.mxu1 %vm840_vm3, %v741_v20 }
 0x1d7   : > { %1553 = vmatprep.subr.mxu1 %v2046_v1 }
 0x1d9   : > { %1551 = vmatmul.mubr.msk.f32.vlgmr.msra.gmra.mrb[2].mxu1 %vm840_vm3, %v645_v23 }
 0x1da   : > { %1002 = vrot.lane.b32.xlu1 %v645_v23, %s2047_s3  ;;  %1555 = vmatprep.mubr.msk.f32.mxu1 %vm2045_vm0, %v2046_v1 }
 0x1e4   : > { %v836_v41 = vpop.f32.mrb[2].mxu0 }
 0x1e5   : > { %v837_v42 = vadd.f32 %v1469_v40, %v836_v41  ;;  %v1547_v43 = vpop.f32.mrb[3].mxu0 }
 0x1e7   : > { %1554 = vmatpush3.msra.mxu1 %v837_v42 }
 0x1e8   : > { %1558 = vmatprep.subr.mxu1 %v2046_v1 }
 0x248   : > { %v1005_v46 = vpop.permute.xlu1 %1004 }
 0x24c   : > { %v1003_v48 = vpop.permute.xlu1 %1002 }
 0x2ac   : > { %v913_v32 = vpop.f32.mrb[2].mxu1 }
 0x2ad   : > { %v1552_v33 = vpop.f32.mrb[3].mxu1  ;;  %v918_v34 = vsel %vm917_vm4, %v913_v32, -inf }
 0x2ae   : > { %919 = vmax.xlane.f32.xlu0 %v918_v34 }
 0x33b   : > { %v920_v35 = vpop.xlane.xlu0 %919 }
 0x33c   : > { %v921_v36 = vsub.f32 %v913_v32, %v920_v35 }
 0x33e   : > { %v922_v37 = vmul.f32 1.442695, %v921_v36 }
 0x340   : > { %1729 = vpow2.f32 %v922_v37 }
 0x34a   : > { %v1730_v38 = vpop.eup %1729 }
 0x34b   : > { %v924_v39 = vsel %vm917_vm4, %v1730_v38, 0.0 }
 0x34c   : > { %925 = vadd.xlane.f32.xlu0 %v924_v39 }
 0x3d9   : > { %v926_v44 = vpop.xlane.xlu0 %925 }
 0x3da   : > { %1731 = vrcp.f32 %v926_v44 }
 0x3e4   : > { %v1732_v45 = vpop.eup %1731 }
 0x3e5   : > { %v928_v47 = vmul.f32 %v1732_v45, %v1730_v38 }
 0x3e7   : > { %1556 = vmatmul.mubr.msk.f32.vlgmr.msra.gmra.mrb[4].mxu1 %vm917_vm4, %v928_v47 }
 0x3e8   : > { %1559 = vmatpush3.xpose.msk.msra.mxu1 %vm840_vm3, %v1005_v46  ;;  %1560 = vmatprep.mubr.msk.f32.mxu1 %vm2045_vm0, %v2046_v1 }
 0x3e9   : > { %1563 = vmatprep.subr.mxu1 %v2046_v1 }
 0x3eb   : > { %1561 = vmatmul.mubr.msk.f32.vlgmr.msra.gmra.mrb[6].mxu1 %vm840_vm3, %v1003_v48 }
 0x3ec   : > { %1565 = vmatprep.mubr.msk.f32.mxu1 %vm2045_vm0, %v2046_v1  ;;  %v1174_v1 = vld [vmem:[#allocation13 + $0x8] sm:$0xff] }
 0x3ed   : > { %v1604_v3 = vpack.c.bf16 %v1174_v1, %v1173_v63 }
 0x3ef   : > { %1605 = vmatpush3.bf16.msra.mxu0 %v1604_v3 }
 0x3f0   : > { %1606 = vmatprep.subr.bf16.mxu0 %v2044_v0 }
 0x3f3   : > { %1608 = vmatpush3.bf16.msra.mxu0 %v1607_v5 }
 0x4ba   : > { %v998_v49 = vpop.f32.mrb[4].mxu1 }
 0x4bb   : > { %v1557_v50 = vpop.f32.mrb[5].mxu1 }
 0x4be   : > { %v1076_v51 = vpop.f32.mrb[6].mxu1 }
 0x4bf   : > { %v1562_v52 = vpop.f32.mrb[7].mxu1  ;;  %v1080_v53 = vsel %vm917_vm4, %v1076_v51, -inf }
 0x4c0   : > { %1081 = vmax.xlane.f32.xlu0 %v1080_v53 }
 0x4d6   : > { %1092 = vrot.lane.b32.xlu0 %v837_v42, %s2047_s3 }
 0x54d   : > { %v1082_v54 = vpop.xlane.xlu0 %1081 }
 0x54e   : > { %v1083_v55 = vsub.f32 %v1076_v51, %v1082_v54 }
 0x550   : > { %v1084_v56 = vmul.f32 1.442695, %v1083_v55 }
 0x551   : > { %v1093_v57 = vpop.permute.xlu0 %1092 }
 0x552   : > { %1733 = vpow2.f32 %v1084_v56  ;;  %1564 = vmatpush3.msra.mxu1 %v1093_v57 }
 0x55c   : > { %v1734_v58 = vpop.eup %1733 }
 0x55d   : > { %v1086_v59 = vsel %vm917_vm4, %v1734_v58, 0.0 }
 0x55e   : > { %1087 = vadd.xlane.f32.xlu1 %v1086_v59 }
 0x5eb   : > { %v1088_v60 = vpop.xlane.xlu1 %1087 }
 0x5ec   : > { %1735 = vrcp.f32 %v1088_v60 }
 0x5f6   : > { %v1736_v61 = vpop.eup %1735 }
 0x5f7   : > { %v1090_v62 = vmul.f32 %v1736_v61, %v1734_v58 }
 0x5f9   : > { %1566 = vmatmul.mubr.msk.f32.vlgmr.msra.gmra.mrb[8].mxu1 %vm917_vm4, %v1090_v62 }
 0x6cc   : > { %v1164_v6 = vpop.f32.mrb[8].mxu1 }
 0x6cd   : > { %1169 = vrot.lane.b32.xlu0 %v1164_v6, %s2048_s28  ;;  %v1567_v7 = vpop.f32.mrb[9].mxu1 }
 0x73f   : > { %v1170_v8 = vpop.permute.xlu0 %1169 }
 0x740   : > { %v1172_v9 = vsel %vm840_vm3, %v998_v49, %v1170_v8 }
 0x741   : > { %1577 = vmatmul.mubr.msk.f32.vlgmr.msra.gmra.mrb[4].mxu0 %vm562_vm1, %v1172_v9 }
 0x814   : > { %v1253_v0 = vpop.f32.mrb[4].mxu0 }
 0x815   : > { %v1254_v11 = vadd.f32 %v1481_v10, %v1253_v0  ;;  %v1578_v12 = vpop.f32.mrb[5].mxu0 }
 0x817   : > { %1257 = vst.msk [vmem:[%s547_s20] sm:$0xff] %vm562_vm1, %v1254_v11 }
 0x818   : > { %1952 = shalt.err (!%p1949_p11)
}
 0x819   : > { %s1953_s21 = scalar_lea.hbm %s2525_s22, 128  ;;  %s1957_s9 = scalar_lea.hbm %s2659_s15, 256 }
 0x81a   : > { %p1954_p5 = scmp.ne.s32.totalorder %s2525_s22, %s1953_s21  ;;  %p1958_p0 = scmp.lt.u32.totalorder %s2525_s22, %s2659_s15 }
 0x81b   : > { %p1959_p4 = scmp.lt.u32.totalorder %s1957_s9, %s1953_s21  ;;  %p1961_p13 = scmp.lt.u32.totalorder %s1953_s21, %s2525_s22 }
 0x81c   : > { %p1955_p3 = pnand %p1954_p5, %p2660_p2 }
 0x81d   : > { %p1960_p10 = por %p1959_p4, %p1958_p0 }
 0x81e   : > { %p1956_p6 = pneg %p1955_p3 }
 0x81f   : > { %p1962_p1 = por %p1961_p13, %p1960_p10 }
 0x821   : > { %p1963_p12 = pnand %p1962_p1, %p1956_p6 }
 0x823   : > { %1966 = shalt.err (!%p1963_p12)
}
 0x824   : > { %1631 = dma.vmem_to_hbm [thread:$0]  (%p2660_p2), %s2527_s27, 128, %s2525_s22, %s1259_s23  }
 0x825 PF: > { %s2661_s28 = sld [smem:[#allocation20_spill]]  ;;  %s2662_s29 = sld [smem:[#allocation27_spill]] }
 0x826   : > { %s2663_s5 = sld [smem:[#allocation23_spill]] }
 0x82b   : > { %s1285_s13 = sand.u32 1, %s2661_s28   ;;  %p2664_p8 = scmp.ne.s32.totalorder %s2662_s29, 0 }
 0x82c   : > { %p2665_p9 = scmp.ge.s32.totalorder %s2663_s5, 2  ;;  %s1286_s1 = scalar_lea.sflag [#allocation4], %s1285_s13 }
 0x82e   : > { %p1657_p7 = pnand %p2665_p9, %p2664_p8 }
 0x830   : > { %2008 = dma.done.wait (!%p1657_p7), %s1286_s1, 128  }
 0x831   : > { %2010 = vsyncadd (!%p1657_p7), %s1286_s1, 4294967168  ;;  %s32_s22 = sadd.s32 1, %s2663_s5   ;;  %s2666_s16 = sld [smem:[#allocation26_spill]] }
 0x832   : > { %p29_p11 = scmp.ge.s32.totalorder %s32_s22, 4   ;;  %s2667_s20 = sld [smem:[#allocation22_spill]] }
 0x833   : > { %s2668_s21 = sld [smem:[#allocation24_spill]]  ;;  %s2669_s17 = smov %s2017_s18 }
 0x834   : > { %s2670_s18 = smov %s2021_s19  ;;  %31 = sbr.rel (!%p29_p11) target bundleno = 17 (0x11), region = 149 }
 0x837   : > { %s2671_s19 = smov %s2666_s16 }
 0x83b   :  { %1291 = vsyncpa [#allocation3], 1 }
 0x83c   :  { %1293 = vsyncpa [#allocation3 + $0x1], 1 }
 0x83d   :  { %1294 = vsyncpa [#allocation6], 1 }
 0x83e   :  { %1296 = vsyncpa [#allocation6 + $0x1], 1 }
 0x83f   :  { %1297 = vsyncpa [#allocation9], 1 }
 0x840   :  { %1298 = vsyncpa [#allocation12], 1 }
 0x841   :  { %1299 = vsyncpa [#allocation4], 1 }
 0x842   :  { %1301 = vsyncpa [#allocation4 + $0x1], 1 }

</bundles_post_ra>
